<compile_context>
chip_gen: v7x
topology: tpu7x:2x2x1
jax: 0.10.0
libtpu: 0.0.40
codegen_flags: <defaults>
</compile_context>

<pallas_src>
import functools

import jax
import jax.numpy as jnp
from jax.experimental import pallas as pl
from jax.experimental.pallas import tpu as pltpu

# ----------------------------- config (stand-in for `config`) ----------------
FULL_RANGE = 128        # config.FULL_RANGE
MOOD_DIMENSION = 4      # config.MOOD_DIMENSION
LAYERS = 2
UNITS = 32
MOOD_UNITS = 16


# ----------------------------- fused forward kernel --------------------------
def _fused_forward_kernel(num_layers,
                          x_ref, moods_ref, mood_fold_ref,
                          wx0_ref, whh0_ref, b0_ref,
                          *rest):
    """Whole forward pass for ONE batch element (grid axis = batch)."""
    n_lw = 3 * (num_layers - 1)
    extra = rest[:n_lw]                               # (wih, whh, b) per layer>0
    out_w_ref = rest[n_lw]
    out_b_ref = rest[n_lw + 1]
    o_ref = rest[n_lw + 2]
    state_refs = rest[n_lw + 3: n_lw + 3 + 2 * num_layers]
    xg_ref = rest[-2]          # (S, 4U) f32 scratch: hoisted input projection
    y_ref = rest[-1]           # (S, U)  f32 scratch: per-layer LSTM output

    S = x_ref.shape[1]
    U = whh0_ref.shape[0]
    bf16 = jnp.bfloat16
    f32 = jnp.float32

    # Mood contribution to the layer-0 gates (constant over time per batch):
    # moods @ (mood_w @ Wih_mood) — the bias parts are pre-folded into b0.
    mood_gate = jnp.dot(moods_ref[0].astype(bf16), mood_fold_ref[...],
                        preferred_element_type=f32)                    # (1, 4U)

    cur = None                 # layer input / residual, natural order (S, U)
    for li in range(num_layers):
        d = 1 << li
        T = S // d

        # Hoisted input projection: one MXU matmul per layer (+ biases).
        if li == 0:
            xg_ref[...] = (jnp.dot(x_ref[0].astype(bf16), wx0_ref[...],
                                   preferred_element_type=f32)
                           + b0_ref[...] + mood_gate)
            whh = whh0_ref[...]
        else:
            wih_ref, whh_ref, b_ref = extra[3 * (li - 1): 3 * li]
            xg_ref[...] = (jnp.dot(cur.astype(bf16), wih_ref[...],
                                   preferred_element_type=f32) + b_ref[...])
            whh = whh_ref[...]

        # Recurrence over the dilated time axis, fully unrolled (T is static).
        h = jnp.zeros((d, U), f32)
        c = jnp.zeros((d, U), f32)
        for t in range(T):
            gates = xg_ref[t * d:(t + 1) * d, :] + jnp.dot(
                h.astype(bf16), whh, preferred_element_type=f32)       # (d, 4U)
            sg = jax.nn.sigmoid(gates)          # one EUP pass, full gate tile
            tg = jnp.tanh(gates)                # one EUP pass, full gate tile
            i_g = sg[:, 0 * U:1 * U]
            f_g = sg[:, 1 * U:2 * U]
            g_g = tg[:, 2 * U:3 * U]
            o_g = sg[:, 3 * U:4 * U]
            c = f_g * c + i_g * g_g
            h = o_g * jnp.tanh(c)
            y_ref[t * d:(t + 1) * d, :] = h     # static-offset VMEM store

        y = y_ref[...]
        if li > 0:
            y = cur + y                          # residual add (torch: i > 0)
        state_refs[2 * li][0] = h                # final (h, c); row order = p
        state_refs[2 * li + 1][0] = c
        cur = y

    # Output projection; 128-lane dense HBM store.
    o_ref[0] = (jnp.dot(cur.astype(bf16), out_w_ref[...],
                        preferred_element_type=f32) + out_b_ref[...])


# ----------------------------- wrapper ----------------------------------------
def fused_forward(inputs, moods, params):
    """inputs: (B, S, FULL_RANGE) f32; moods: (B, MOOD_DIMENSION) f32."""
    B, S, FR = inputs.shape
    U = UNITS
    num_layers = len(params["layers"])
    bf = jnp.bfloat16

    # Parameter-level folding of the mood path (tiny, once per call, f32):
    #   gates0 = x @ Wih_x + moods @ (mood_w @ Wih_m) + (mood_b @ Wih_m + b0)
    lp0 = params["layers"][0]
    wih0 = lp0["wih"]
    wx0 = wih0[:FR].astype(bf)                       # x-part of layer-0 weights
    wm0 = wih0[FR:]                                  # mood-part (MU, 4U) f32
    mood_fold = (params["mood_w"] @ wm0).astype(bf)  # (MOOD_DIM, 4U)
    b0 = lp0["b"] + params["mood_b"] @ wm0           # (1, 4U) f32
    whh0 = lp0["whh"].astype(bf)
    out_w = params["out_w"].astype(bf)
    out_b = params["out_b"]
    moods3 = moods.reshape(B, 1, MOOD_DIMENSION)

    args = [inputs, moods3, mood_fold, wx0, whh0, b0]
    in_specs = [
        pl.BlockSpec((1, S, FR), lambda b: (b, 0, 0)),
        pl.BlockSpec((1, 1, MOOD_DIMENSION), lambda b: (b, 0, 0)),
        pl.BlockSpec(mood_fold.shape, lambda b: (0, 0)),
        pl.BlockSpec(wx0.shape, lambda b: (0, 0)),
        pl.BlockSpec(whh0.shape, lambda b: (0, 0)),
        pl.BlockSpec(b0.shape, lambda b: (0, 0)),
    ]
    for lp in params["layers"][1:]:
        wih = lp["wih"].astype(bf)
        whh = lp["whh"].astype(bf)
        bb = lp["b"]
        args += [wih, whh, bb]
        in_specs += [pl.BlockSpec(wih.shape, lambda b: (0, 0)),
                     pl.BlockSpec(whh.shape, lambda b: (0, 0)),
                     pl.BlockSpec(bb.shape, lambda b: (0, 0))]
    args += [out_w, out_b]
    in_specs += [pl.BlockSpec(out_w.shape, lambda b: (0, 0)),
                 pl.BlockSpec(out_b.shape, lambda b: (0, 0))]

    out_shapes = [jax.ShapeDtypeStruct((B, S, FR), jnp.float32)]
    out_specs = [pl.BlockSpec((1, S, FR), lambda b: (b, 0, 0))]
    for li in range(num_layers):
        d = 2 ** li
        for _ in range(2):      # h, c
            out_shapes.append(jax.ShapeDtypeStruct((B, d, U), jnp.float32))
            out_specs.append(pl.BlockSpec((1, d, U), lambda b: (b, 0, 0)))

    # TODO(synk): for long sequences, chunk S with a second ("arbitrary") grid
    # axis and carry h/c in VMEM scratch to stay inside v7x's 64 MiB VMEM.
    results = pl.pallas_call(
        functools.partial(_fused_forward_kernel, num_layers),
        grid=(B,),
        in_specs=in_specs,
        out_specs=tuple(out_specs),
        out_shape=tuple(out_shapes),
        scratch_shapes=[pltpu.VMEM((S, 4 * U), jnp.float32),
                        pltpu.VMEM((S, U), jnp.float32)],
        compiler_params=pltpu.CompilerParams(
            dimension_semantics=("parallel",)),
    )(*args)

    out = results[0]
    states = []
    for li in range(num_layers):
        d = 2 ** li
        h = results[1 + 2 * li].reshape(B * d, U)
        c = results[2 + 2 * li].reshape(B * d, U)
        states.append((h, c))
    return out, states


# ----------------------------- parameters -------------------------------------
def init_params(key):
    params = {}
    k_mood, k_out, k_layers = jax.random.split(key, 3)

    def uniform(k, shape, bound):
        return jax.random.uniform(k, shape, jnp.float32, -bound, bound)

    # mood_layer: Linear(MOOD_DIMENSION, MOOD_UNITS)
    bm = 1.0 / jnp.sqrt(MOOD_DIMENSION)
    km1, km2 = jax.random.split(k_mood)
    params["mood_w"] = uniform(km1, (MOOD_DIMENSION, MOOD_UNITS), bm)
    params["mood_b"] = uniform(km2, (1, MOOD_UNITS), bm)

    # output_layer: Linear(UNITS, FULL_RANGE)
    bo = 1.0 / jnp.sqrt(UNITS)
    ko1, ko2 = jax.random.split(k_out)
    params["out_w"] = uniform(ko1, (UNITS, FULL_RANGE), bo)
    params["out_b"] = uniform(ko2, (1, FULL_RANGE), bo)

    # LSTM stack: layer 0 input = FULL_RANGE + MOOD_UNITS, rest = UNITS
    bl = 1.0 / jnp.sqrt(UNITS)
    layer_params = []
    keys = jax.random.split(k_layers, LAYERS)
    for li in range(LAYERS):
        in_dim = FULL_RANGE + MOOD_UNITS if li == 0 else UNITS
        k1, k2, k3, k4 = jax.random.split(keys[li], 4)
        wih = uniform(k1, (in_dim, 4 * UNITS), bl)        # transposed vs torch
        whh = uniform(k2, (UNITS, 4 * UNITS), bl)
        bias = uniform(k3, (1, 4 * UNITS), bl) + uniform(k4, (1, 4 * UNITS), bl)
        layer_params.append({"wih": wih, "whh": whh, "b": bias})
    params["layers"] = layer_params
    return params


# ----------------------------- forward -----------------------------------------
@jax.jit
def model_forward(inputs, moods, params):
    return fused_forward(inputs, moods, params)


# TODO(synk): the seq_len == 1 incremental-generation branch (per-step dilated
# state rotation) is stateful Python bookkeeping and is not implemented here.

if __name__ == "__main__":
    key = jax.random.PRNGKey(0)
    kp, kx, km = jax.random.split(key, 3)

    B, S = 2, 8
    params = init_params(kp)
    inputs = jax.random.normal(kx, (B, S, FULL_RANGE), jnp.float32)
    moods = jax.random.normal(km, (B, MOOD_DIMENSION), jnp.float32)

    outputs, states = model_forward(inputs, moods, params)
    jax.block_until_ready(outputs)
    jax.block_until_ready(states)

    assert outputs.shape == (B, S, FULL_RANGE)
    assert len(states) == LAYERS
    for li in range(LAYERS):
        d = 2 ** li
        assert states[li][0].shape == (B * d, UNITS)
        assert states[li][1].shape == (B * d, UNITS)
    assert bool(jnp.isfinite(outputs).all())
    print("KERNEL_OK")
</pallas_src>

<mosaic_0001>
module attributes {stable_mosaic.version = 11 : i64} {
  func.func @_fused_forward_kernel(%arg0: i32, %arg1: memref<1x8x128xf32, #tpu.memory_space<vmem>>, %arg2: memref<1x1x4xf32, #tpu.memory_space<vmem>>, %arg3: memref<4x128xbf16, #tpu.memory_space<vmem>>, %arg4: memref<128x128xbf16, #tpu.memory_space<vmem>>, %arg5: memref<32x128xbf16, #tpu.memory_space<vmem>>, %arg6: memref<1x128xf32, #tpu.memory_space<vmem>>, %arg7: memref<32x128xbf16, #tpu.memory_space<vmem>>, %arg8: memref<32x128xbf16, #tpu.memory_space<vmem>>, %arg9: memref<1x128xf32, #tpu.memory_space<vmem>>, %arg10: memref<32x128xbf16, #tpu.memory_space<vmem>>, %arg11: memref<1x128xf32, #tpu.memory_space<vmem>>, %arg12: memref<1x8x128xf32, #tpu.memory_space<vmem>>, %arg13: memref<1x1x32xf32, #tpu.memory_space<vmem>>, %arg14: memref<1x1x32xf32, #tpu.memory_space<vmem>>, %arg15: memref<1x2x32xf32, #tpu.memory_space<vmem>>, %arg16: memref<1x2x32xf32, #tpu.memory_space<vmem>>, %arg17: memref<8x128xf32, #tpu.memory_space<vmem>>, %arg18: memref<8x32xf32, #tpu.memory_space<vmem>>) attributes {dimension_semantics = [#tpu.dimension_semantics<parallel>], iteration_bounds = array<i64: 2>, scalar_prefetch = 0 : i64, scratch_operands = 2 : i64, tpu.core_type = #tpu.core_type<tc>, window_params = [{transform_indices = @transform_0, window_bounds = array<i64: 1, 8, 128>}, {transform_indices = @transform_1, window_bounds = array<i64: 1, 1, 4>}, {pipeline_mode = #tpu.pipeline_mode<synchronous>, transform_indices = @transform_2, window_bounds = array<i64: 4, 128>}, {pipeline_mode = #tpu.pipeline_mode<synchronous>, transform_indices = @transform_3, window_bounds = array<i64: 128, 128>}, {pipeline_mode = #tpu.pipeline_mode<synchronous>, transform_indices = @transform_4, window_bounds = array<i64: 32, 128>}, {pipeline_mode = #tpu.pipeline_mode<synchronous>, transform_indices = @transform_5, window_bounds = array<i64: 1, 128>}, {pipeline_mode = #tpu.pipeline_mode<synchronous>, transform_indices = @transform_6, window_bounds = array<i64: 32, 128>}, {pipeline_mode = #tpu.pipeline_mode<synchronous>, transform_indices = @transform_7, window_bounds = array<i64: 32, 128>}, {pipeline_mode = #tpu.pipeline_mode<synchronous>, transform_indices = @transform_8, window_bounds = array<i64: 1, 128>}, {pipeline_mode = #tpu.pipeline_mode<synchronous>, transform_indices = @transform_9, window_bounds = array<i64: 32, 128>}, {pipeline_mode = #tpu.pipeline_mode<synchronous>, transform_indices = @transform_10, window_bounds = array<i64: 1, 128>}, {transform_indices = @transform_11, window_bounds = array<i64: 1, 8, 128>}, {transform_indices = @transform_12, window_bounds = array<i64: 1, 1, 32>}, {transform_indices = @transform_13, window_bounds = array<i64: 1, 1, 32>}, {transform_indices = @transform_14, window_bounds = array<i64: 1, 2, 32>}, {transform_indices = @transform_15, window_bounds = array<i64: 1, 2, 32>}]} {
    %c0 = arith.constant 0 : index
    %c0_0 = arith.constant 0 : index
    %c0_1 = arith.constant 0 : index
    %0 = vector.load %arg2[%c0, %c0_0, %c0_1] : memref<1x1x4xf32, #tpu.memory_space<vmem>>, vector<1x1x4xf32>
    %1 = vector.shape_cast %0 : vector<1x1x4xf32> to vector<1x4xf32>
    %2 = arith.truncf %1 : vector<1x4xf32> to vector<1x4xbf16>
    %c0_2 = arith.constant 0 : index
    %c0_3 = arith.constant 0 : index
    %3 = vector.load %arg3[%c0_2, %c0_3] : memref<4x128xbf16, #tpu.memory_space<vmem>>, vector<4x128xbf16>
    %cst = arith.constant dense<0.000000e+00> : vector<1x128xf32>
    %4 = tpu.matmul %2, %3, %cst {dimension_numbers = #tpu.dot_dimension_numbers<[1], [0], [0], [1], [0, 0, 1, 1], [], []>} : vector<1x4xbf16>, vector<4x128xbf16>, vector<1x128xf32> -> vector<1x128xf32>
    %c0_4 = arith.constant 0 : index
    %c0_5 = arith.constant 0 : index
    %c0_6 = arith.constant 0 : index
    %5 = vector.load %arg1[%c0_4, %c0_5, %c0_6] : memref<1x8x128xf32, #tpu.memory_space<vmem>>, vector<1x8x128xf32>
    %6 = vector.shape_cast %5 : vector<1x8x128xf32> to vector<8x128xf32>
    %7 = arith.truncf %6 : vector<8x128xf32> to vector<8x128xbf16>
    %c0_7 = arith.constant 0 : index
    %c0_8 = arith.constant 0 : index
    %8 = vector.load %arg4[%c0_7, %c0_8] : memref<128x128xbf16, #tpu.memory_space<vmem>>, vector<128x128xbf16>
    %cst_9 = arith.constant dense<0.000000e+00> : vector<8x128xf32>
    %9 = tpu.matmul %7, %8, %cst_9 {dimension_numbers = #tpu.dot_dimension_numbers<[1], [0], [0], [1], [0, 0, 1, 1], [], []>} : vector<8x128xbf16>, vector<128x128xbf16>, vector<8x128xf32> -> vector<8x128xf32>
    %c0_10 = arith.constant 0 : index
    %c0_11 = arith.constant 0 : index
    %10 = vector.load %arg6[%c0_10, %c0_11] : memref<1x128xf32, #tpu.memory_space<vmem>>, vector<1x128xf32>
    %11 = vector.broadcast %10 : vector<1x128xf32> to vector<8x128xf32>
    %12 = arith.addf %9, %11 : vector<8x128xf32>
    %13 = vector.broadcast %4 : vector<1x128xf32> to vector<8x128xf32>
    %14 = arith.addf %12, %13 : vector<8x128xf32>
    %c0_12 = arith.constant 0 : index
    %c0_13 = arith.constant 0 : index
    %15 = vector.load %arg17[%c0_12, %c0_13] : memref<8x128xf32, #tpu.memory_space<vmem>>, vector<8x128xf32>
    tpu.vector_store %arg17[%c0_12, %c0_13], %14 {strides = array<i32>} : memref<8x128xf32, #tpu.memory_space<vmem>>, vector<8x128xf32>,
    %c0_14 = arith.constant 0 : index
    %c0_15 = arith.constant 0 : index
    %16 = vector.load %arg5[%c0_14, %c0_15] : memref<32x128xbf16, #tpu.memory_space<vmem>>, vector<32x128xbf16>
    %cst_16 = arith.constant 0.000000e+00 : f32
    %17 = vector.broadcast %cst_16 : f32 to vector<1x32xf32>
    %cst_17 = arith.constant 0.000000e+00 : f32
    %18 = vector.broadcast %cst_17 : f32 to vector<1x32xf32>
    %c0_18 = arith.constant 0 : index
    %c0_19 = arith.constant 0 : index
    %19 = vector.load %arg17[%c0_18, %c0_19] : memref<8x128xf32, #tpu.memory_space<vmem>>, vector<1x128xf32>
    %20 = arith.truncf %17 : vector<1x32xf32> to vector<1x32xbf16>
    %cst_20 = arith.constant dense<0.000000e+00> : vector<1x128xf32>
    %21 = tpu.matmul %20, %16, %cst_20 {dimension_numbers = #tpu.dot_dimension_numbers<[1], [0], [0], [1], [0, 0, 1, 1], [], []>} : vector<1x32xbf16>, vector<32x128xbf16>, vector<1x128xf32> -> vector<1x128xf32>
    %22 = arith.addf %19, %21 : vector<1x128xf32>
    %23 = arith.negf %22 : vector<1x128xf32>
    %24 = math.exp %23 : vector<1x128xf32>
    %cst_21 = arith.constant 1.000000e+00 : f32
    %25 = vector.broadcast %cst_21 : f32 to vector<1x128xf32>
    %26 = arith.addf %25, %24 : vector<1x128xf32>
    %27 = arith.divf %25, %26 : vector<1x128xf32>
    %28 = math.tanh %22 : vector<1x128xf32>
    %29 = vector.extract_strided_slice %27 {offsets = [0, 0], sizes = [1, 32], strides = [1, 1]} : vector<1x128xf32> to vector<1x32xf32>
    %30 = vector.extract_strided_slice %27 {offsets = [0, 32], sizes = [1, 32], strides = [1, 1]} : vector<1x128xf32> to vector<1x32xf32>
    %31 = vector.extract_strided_slice %28 {offsets = [0, 64], sizes = [1, 32], strides = [1, 1]} : vector<1x128xf32> to vector<1x32xf32>
    %32 = vector.extract_strided_slice %27 {offsets = [0, 96], sizes = [1, 32], strides = [1, 1]} : vector<1x128xf32> to vector<1x32xf32>
    %33 = arith.mulf %30, %18 : vector<1x32xf32>
    %34 = arith.mulf %29, %31 : vector<1x32xf32>
    %35 = arith.addf %33, %34 : vector<1x32xf32>
    %36 = math.tanh %35 : vector<1x32xf32>
    %37 = arith.mulf %32, %36 : vector<1x32xf32>
    %c0_22 = arith.constant 0 : index
    %c0_23 = arith.constant 0 : index
    %38 = vector.load %arg18[%c0_22, %c0_23] : memref<8x32xf32, #tpu.memory_space<vmem>>, vector<1x32xf32>
    tpu.vector_store %arg18[%c0_22, %c0_23], %37 {strides = array<i32>} : memref<8x32xf32, #tpu.memory_space<vmem>>, vector<1x32xf32>,
    %c1 = arith.constant 1 : index
    %c0_24 = arith.constant 0 : index
    %39 = vector.load %arg17[%c1, %c0_24] : memref<8x128xf32, #tpu.memory_space<vmem>>, vector<1x128xf32>
    %40 = arith.truncf %37 : vector<1x32xf32> to vector<1x32xbf16>
    %cst_25 = arith.constant dense<0.000000e+00> : vector<1x128xf32>
    %41 = tpu.matmul %40, %16, %cst_25 {dimension_numbers = #tpu.dot_dimension_numbers<[1], [0], [0], [1], [0, 0, 1, 1], [], []>} : vector<1x32xbf16>, vector<32x128xbf16>, vector<1x128xf32> -> vector<1x128xf32>
    %42 = arith.addf %39, %41 : vector<1x128xf32>
    %43 = arith.negf %42 : vector<1x128xf32>
    %44 = math.exp %43 : vector<1x128xf32>
    %cst_26 = arith.constant 1.000000e+00 : f32
    %45 = vector.broadcast %cst_26 : f32 to vector<1x128xf32>
    %46 = arith.addf %45, %44 : vector<1x128xf32>
    %47 = arith.divf %45, %46 : vector<1x128xf32>
    %48 = math.tanh %42 : vector<1x128xf32>
    %49 = vector.extract_strided_slice %47 {offsets = [0, 0], sizes = [1, 32], strides = [1, 1]} : vector<1x128xf32> to vector<1x32xf32>
    %50 = vector.extract_strided_slice %47 {offsets = [0, 32], sizes = [1, 32], strides = [1, 1]} : vector<1x128xf32> to vector<1x32xf32>
    %51 = vector.extract_strided_slice %48 {offsets = [0, 64], sizes = [1, 32], strides = [1, 1]} : vector<1x128xf32> to vector<1x32xf32>
    %52 = vector.extract_strided_slice %47 {offsets = [0, 96], sizes = [1, 32], strides = [1, 1]} : vector<1x128xf32> to vector<1x32xf32>
    %53 = arith.mulf %50, %35 : vector<1x32xf32>
    %54 = arith.mulf %49, %51 : vector<1x32xf32>
    %55 = arith.addf %53, %54 : vector<1x32xf32>
    %56 = math.tanh %55 : vector<1x32xf32>
    %57 = arith.mulf %52, %56 : vector<1x32xf32>
    %c1_27 = arith.constant 1 : index
    %c0_28 = arith.constant 0 : index
    %58 = vector.load %arg18[%c1_27, %c0_28] : memref<8x32xf32, #tpu.memory_space<vmem>>, vector<1x32xf32>
    tpu.vector_store %arg18[%c1_27, %c0_28], %57 {strides = array<i32>} : memref<8x32xf32, #tpu.memory_space<vmem>>, vector<1x32xf32>,
    %c2 = arith.constant 2 : index
    %c0_29 = arith.constant 0 : index
    %59 = vector.load %arg17[%c2, %c0_29] : memref<8x128xf32, #tpu.memory_space<vmem>>, vector<1x128xf32>
    %60 = arith.truncf %57 : vector<1x32xf32> to vector<1x32xbf16>
    %cst_30 = arith.constant dense<0.000000e+00> : vector<1x128xf32>
    %61 = tpu.matmul %60, %16, %cst_30 {dimension_numbers = #tpu.dot_dimension_numbers<[1], [0], [0], [1], [0, 0, 1, 1], [], []>} : vector<1x32xbf16>, vector<32x128xbf16>, vector<1x128xf32> -> vector<1x128xf32>
    %62 = arith.addf %59, %61 : vector<1x128xf32>
    %63 = arith.negf %62 : vector<1x128xf32>
    %64 = math.exp %63 : vector<1x128xf32>
    %cst_31 = arith.constant 1.000000e+00 : f32
    %65 = vector.broadcast %cst_31 : f32 to vector<1x128xf32>
    %66 = arith.addf %65, %64 : vector<1x128xf32>
    %67 = arith.divf %65, %66 : vector<1x128xf32>
    %68 = math.tanh %62 : vector<1x128xf32>
    %69 = vector.extract_strided_slice %67 {offsets = [0, 0], sizes = [1, 32], strides = [1, 1]} : vector<1x128xf32> to vector<1x32xf32>
    %70 = vector.extract_strided_slice %67 {offsets = [0, 32], sizes = [1, 32], strides = [1, 1]} : vector<1x128xf32> to vector<1x32xf32>
    %71 = vector.extract_strided_slice %68 {offsets = [0, 64], sizes = [1, 32], strides = [1, 1]} : vector<1x128xf32> to vector<1x32xf32>
    %72 = vector.extract_strided_slice %67 {offsets = [0, 96], sizes = [1, 32], strides = [1, 1]} : vector<1x128xf32> to vector<1x32xf32>
    %73 = arith.mulf %70, %55 : vector<1x32xf32>
    %74 = arith.mulf %69, %71 : vector<1x32xf32>
    %75 = arith.addf %73, %74 : vector<1x32xf32>
    %76 = math.tanh %75 : vector<1x32xf32>
    %77 = arith.mulf %72, %76 : vector<1x32xf32>
    %c2_32 = arith.constant 2 : index
    %c0_33 = arith.constant 0 : index
    %78 = vector.load %arg18[%c2_32, %c0_33] : memref<8x32xf32, #tpu.memory_space<vmem>>, vector<1x32xf32>
    tpu.vector_store %arg18[%c2_32, %c0_33], %77 {strides = array<i32>} : memref<8x32xf32, #tpu.memory_space<vmem>>, vector<1x32xf32>,
    %c3 = arith.constant 3 : index
    %c0_34 = arith.constant 0 : index
    %79 = vector.load %arg17[%c3, %c0_34] : memref<8x128xf32, #tpu.memory_space<vmem>>, vector<1x128xf32>
    %80 = arith.truncf %77 : vector<1x32xf32> to vector<1x32xbf16>
    %cst_35 = arith.constant dense<0.000000e+00> : vector<1x128xf32>
    %81 = tpu.matmul %80, %16, %cst_35 {dimension_numbers = #tpu.dot_dimension_numbers<[1], [0], [0], [1], [0, 0, 1, 1], [], []>} : vector<1x32xbf16>, vector<32x128xbf16>, vector<1x128xf32> -> vector<1x128xf32>
    %82 = arith.addf %79, %81 : vector<1x128xf32>
    %83 = arith.negf %82 : vector<1x128xf32>
    %84 = math.exp %83 : vector<1x128xf32>
    %cst_36 = arith.constant 1.000000e+00 : f32
    %85 = vector.broadcast %cst_36 : f32 to vector<1x128xf32>
    %86 = arith.addf %85, %84 : vector<1x128xf32>
    %87 = arith.divf %85, %86 : vector<1x128xf32>
    %88 = math.tanh %82 : vector<1x128xf32>
    %89 = vector.extract_strided_slice %87 {offsets = [0, 0], sizes = [1, 32], strides = [1, 1]} : vector<1x128xf32> to vector<1x32xf32>
    %90 = vector.extract_strided_slice %87 {offsets = [0, 32], sizes = [1, 32], strides = [1, 1]} : vector<1x128xf32> to vector<1x32xf32>
    %91 = vector.extract_strided_slice %88 {offsets = [0, 64], sizes = [1, 32], strides = [1, 1]} : vector<1x128xf32> to vector<1x32xf32>
    %92 = vector.extract_strided_slice %87 {offsets = [0, 96], sizes = [1, 32], strides = [1, 1]} : vector<1x128xf32> to vector<1x32xf32>
    %93 = arith.mulf %90, %75 : vector<1x32xf32>
    %94 = arith.mulf %89, %91 : vector<1x32xf32>
    %95 = arith.addf %93, %94 : vector<1x32xf32>
    %96 = math.tanh %95 : vector<1x32xf32>
    %97 = arith.mulf %92, %96 : vector<1x32xf32>
    %c3_37 = arith.constant 3 : index
    %c0_38 = arith.constant 0 : index
    %98 = vector.load %arg18[%c3_37, %c0_38] : memref<8x32xf32, #tpu.memory_space<vmem>>, vector<1x32xf32>
    tpu.vector_store %arg18[%c3_37, %c0_38], %97 {strides = array<i32>} : memref<8x32xf32, #tpu.memory_space<vmem>>, vector<1x32xf32>,
    %c4 = arith.constant 4 : index
    %c0_39 = arith.constant 0 : index
    %99 = vector.load %arg17[%c4, %c0_39] : memref<8x128xf32, #tpu.memory_space<vmem>>, vector<1x128xf32>
    %100 = arith.truncf %97 : vector<1x32xf32> to vector<1x32xbf16>
    %cst_40 = arith.constant dense<0.000000e+00> : vector<1x128xf32>
    %101 = tpu.matmul %100, %16, %cst_40 {dimension_numbers = #tpu.dot_dimension_numbers<[1], [0], [0], [1], [0, 0, 1, 1], [], []>} : vector<1x32xbf16>, vector<32x128xbf16>, vector<1x128xf32> -> vector<1x128xf32>
    %102 = arith.addf %99, %101 : vector<1x128xf32>
    %103 = arith.negf %102 : vector<1x128xf32>
    %104 = math.exp %103 : vector<1x128xf32>
    %cst_41 = arith.constant 1.000000e+00 : f32
    %105 = vector.broadcast %cst_41 : f32 to vector<1x128xf32>
    %106 = arith.addf %105, %104 : vector<1x128xf32>
    %107 = arith.divf %105, %106 : vector<1x128xf32>
    %108 = math.tanh %102 : vector<1x128xf32>
    %109 = vector.extract_strided_slice %107 {offsets = [0, 0], sizes = [1, 32], strides = [1, 1]} : vector<1x128xf32> to vector<1x32xf32>
    %110 = vector.extract_strided_slice %107 {offsets = [0, 32], sizes = [1, 32], strides = [1, 1]} : vector<1x128xf32> to vector<1x32xf32>
    %111 = vector.extract_strided_slice %108 {offsets = [0, 64], sizes = [1, 32], strides = [1, 1]} : vector<1x128xf32> to vector<1x32xf32>
    %112 = vector.extract_strided_slice %107 {offsets = [0, 96], sizes = [1, 32], strides = [1, 1]} : vector<1x128xf32> to vector<1x32xf32>
    %113 = arith.mulf %110, %95 : vector<1x32xf32>
    %114 = arith.mulf %109, %111 : vector<1x32xf32>
    %115 = arith.addf %113, %114 : vector<1x32xf32>
    %116 = math.tanh %115 : vector<1x32xf32>
    %117 = arith.mulf %112, %116 : vector<1x32xf32>
    %c4_42 = arith.constant 4 : index
    %c0_43 = arith.constant 0 : index
    %118 = vector.load %arg18[%c4_42, %c0_43] : memref<8x32xf32, #tpu.memory_space<vmem>>, vector<1x32xf32>
    tpu.vector_store %arg18[%c4_42, %c0_43], %117 {strides = array<i32>} : memref<8x32xf32, #tpu.memory_space<vmem>>, vector<1x32xf32>,
    %c5 = arith.constant 5 : index
    %c0_44 = arith.constant 0 : index
    %119 = vector.load %arg17[%c5, %c0_44] : memref<8x128xf32, #tpu.memory_space<vmem>>, vector<1x128xf32>
    %120 = arith.truncf %117 : vector<1x32xf32> to vector<1x32xbf16>
    %cst_45 = arith.constant dense<0.000000e+00> : vector<1x128xf32>
    %121 = tpu.matmul %120, %16, %cst_45 {dimension_numbers = #tpu.dot_dimension_numbers<[1], [0], [0], [1], [0, 0, 1, 1], [], []>} : vector<1x32xbf16>, vector<32x128xbf16>, vector<1x128xf32> -> vector<1x128xf32>
    %122 = arith.addf %119, %121 : vector<1x128xf32>
    %123 = arith.negf %122 : vector<1x128xf32>
    %124 = math.exp %123 : vector<1x128xf32>
    %cst_46 = arith.constant 1.000000e+00 : f32
    %125 = vector.broadcast %cst_46 : f32 to vector<1x128xf32>
    %126 = arith.addf %125, %124 : vector<1x128xf32>
    %127 = arith.divf %125, %126 : vector<1x128xf32>
    %128 = math.tanh %122 : vector<1x128xf32>
    %129 = vector.extract_strided_slice %127 {offsets = [0, 0], sizes = [1, 32], strides = [1, 1]} : vector<1x128xf32> to vector<1x32xf32>
    %130 = vector.extract_strided_slice %127 {offsets = [0, 32], sizes = [1, 32], strides = [1, 1]} : vector<1x128xf32> to vector<1x32xf32>
    %131 = vector.extract_strided_slice %128 {offsets = [0, 64], sizes = [1, 32], strides = [1, 1]} : vector<1x128xf32> to vector<1x32xf32>
    %132 = vector.extract_strided_slice %127 {offsets = [0, 96], sizes = [1, 32], strides = [1, 1]} : vector<1x128xf32> to vector<1x32xf32>
    %133 = arith.mulf %130, %115 : vector<1x32xf32>
    %134 = arith.mulf %129, %131 : vector<1x32xf32>
    %135 = arith.addf %133, %134 : vector<1x32xf32>
    %136 = math.tanh %135 : vector<1x32xf32>
    %137 = arith.mulf %132, %136 : vector<1x32xf32>
    %c5_47 = arith.constant 5 : index
    %c0_48 = arith.constant 0 : index
    %138 = vector.load %arg18[%c5_47, %c0_48] : memref<8x32xf32, #tpu.memory_space<vmem>>, vector<1x32xf32>
    tpu.vector_store %arg18[%c5_47, %c0_48], %137 {strides = array<i32>} : memref<8x32xf32, #tpu.memory_space<vmem>>, vector<1x32xf32>,
    %c6 = arith.constant 6 : index
    %c0_49 = arith.constant 0 : index
    %139 = vector.load %arg17[%c6, %c0_49] : memref<8x128xf32, #tpu.memory_space<vmem>>, vector<1x128xf32>
    %140 = arith.truncf %137 : vector<1x32xf32> to vector<1x32xbf16>
    %cst_50 = arith.constant dense<0.000000e+00> : vector<1x128xf32>
    %141 = tpu.matmul %140, %16, %cst_50 {dimension_numbers = #tpu.dot_dimension_numbers<[1], [0], [0], [1], [0, 0, 1, 1], [], []>} : vector<1x32xbf16>, vector<32x128xbf16>, vector<1x128xf32> -> vector<1x128xf32>
    %142 = arith.addf %139, %141 : vector<1x128xf32>
    %143 = arith.negf %142 : vector<1x128xf32>
    %144 = math.exp %143 : vector<1x128xf32>
    %cst_51 = arith.constant 1.000000e+00 : f32
    %145 = vector.broadcast %cst_51 : f32 to vector<1x128xf32>
    %146 = arith.addf %145, %144 : vector<1x128xf32>
    %147 = arith.divf %145, %146 : vector<1x128xf32>
    %148 = math.tanh %142 : vector<1x128xf32>
    %149 = vector.extract_strided_slice %147 {offsets = [0, 0], sizes = [1, 32], strides = [1, 1]} : vector<1x128xf32> to vector<1x32xf32>
    %150 = vector.extract_strided_slice %147 {offsets = [0, 32], sizes = [1, 32], strides = [1, 1]} : vector<1x128xf32> to vector<1x32xf32>
    %151 = vector.extract_strided_slice %148 {offsets = [0, 64], sizes = [1, 32], strides = [1, 1]} : vector<1x128xf32> to vector<1x32xf32>
    %152 = vector.extract_strided_slice %147 {offsets = [0, 96], sizes = [1, 32], strides = [1, 1]} : vector<1x128xf32> to vector<1x32xf32>
    %153 = arith.mulf %150, %135 : vector<1x32xf32>
    %154 = arith.mulf %149, %151 : vector<1x32xf32>
    %155 = arith.addf %153, %154 : vector<1x32xf32>
    %156 = math.tanh %155 : vector<1x32xf32>
    %157 = arith.mulf %152, %156 : vector<1x32xf32>
    %c6_52 = arith.constant 6 : index
    %c0_53 = arith.constant 0 : index
    %158 = vector.load %arg18[%c6_52, %c0_53] : memref<8x32xf32, #tpu.memory_space<vmem>>, vector<1x32xf32>
    tpu.vector_store %arg18[%c6_52, %c0_53], %157 {strides = array<i32>} : memref<8x32xf32, #tpu.memory_space<vmem>>, vector<1x32xf32>,
    %c7 = arith.constant 7 : index
    %c0_54 = arith.constant 0 : index
    %159 = vector.load %arg17[%c7, %c0_54] : memref<8x128xf32, #tpu.memory_space<vmem>>, vector<1x128xf32>
    %160 = arith.truncf %157 : vector<1x32xf32> to vector<1x32xbf16>
    %cst_55 = arith.constant dense<0.000000e+00> : vector<1x128xf32>
    %161 = tpu.matmul %160, %16, %cst_55 {dimension_numbers = #tpu.dot_dimension_numbers<[1], [0], [0], [1], [0, 0, 1, 1], [], []>} : vector<1x32xbf16>, vector<32x128xbf16>, vector<1x128xf32> -> vector<1x128xf32>
    %162 = arith.addf %159, %161 : vector<1x128xf32>
    %163 = arith.negf %162 : vector<1x128xf32>
    %164 = math.exp %163 : vector<1x128xf32>
    %cst_56 = arith.constant 1.000000e+00 : f32
    %165 = vector.broadcast %cst_56 : f32 to vector<1x128xf32>
    %166 = arith.addf %165, %164 : vector<1x128xf32>
    %167 = arith.divf %165, %166 : vector<1x128xf32>
    %168 = math.tanh %162 : vector<1x128xf32>
    %169 = vector.extract_strided_slice %167 {offsets = [0, 0], sizes = [1, 32], strides = [1, 1]} : vector<1x128xf32> to vector<1x32xf32>
    %170 = vector.extract_strided_slice %167 {offsets = [0, 32], sizes = [1, 32], strides = [1, 1]} : vector<1x128xf32> to vector<1x32xf32>
    %171 = vector.extract_strided_slice %168 {offsets = [0, 64], sizes = [1, 32], strides = [1, 1]} : vector<1x128xf32> to vector<1x32xf32>
    %172 = vector.extract_strided_slice %167 {offsets = [0, 96], sizes = [1, 32], strides = [1, 1]} : vector<1x128xf32> to vector<1x32xf32>
    %173 = arith.mulf %170, %155 : vector<1x32xf32>
    %174 = arith.mulf %169, %171 : vector<1x32xf32>
    %175 = arith.addf %173, %174 : vector<1x32xf32>
    %176 = math.tanh %175 : vector<1x32xf32>
    %177 = arith.mulf %172, %176 : vector<1x32xf32>
    %c7_57 = arith.constant 7 : index
    %c0_58 = arith.constant 0 : index
    %178 = vector.load %arg18[%c7_57, %c0_58] : memref<8x32xf32, #tpu.memory_space<vmem>>, vector<1x32xf32>
    tpu.vector_store %arg18[%c7_57, %c0_58], %177 {strides = array<i32>} : memref<8x32xf32, #tpu.memory_space<vmem>>, vector<1x32xf32>,
    %c0_59 = arith.constant 0 : index
    %c0_60 = arith.constant 0 : index
    %179 = vector.load %arg18[%c0_59, %c0_60] : memref<8x32xf32, #tpu.memory_space<vmem>>, vector<8x32xf32>
    %c0_61 = arith.constant 0 : index
    %c0_62 = arith.constant 0 : index
    %c0_63 = arith.constant 0 : index
    %180 = vector.load %arg13[%c0_61, %c0_62, %c0_63] : memref<1x1x32xf32, #tpu.memory_space<vmem>>, vector<1x1x32xf32>
    %181 = vector.shape_cast %180 : vector<1x1x32xf32> to vector<1x32xf32>
    %182 = vector.shape_cast %177 : vector<1x32xf32> to vector<1x1x32xf32>
    tpu.vector_store %arg13[%c0_61, %c0_62, %c0_63], %182 {strides = array<i32>} : memref<1x1x32xf32, #tpu.memory_space<vmem>>, vector<1x1x32xf32>,
    %c0_64 = arith.constant 0 : index
    %c0_65 = arith.constant 0 : index
    %c0_66 = arith.constant 0 : index
    %183 = vector.load %arg14[%c0_64, %c0_65, %c0_66] : memref<1x1x32xf32, #tpu.memory_space<vmem>>, vector<1x1x32xf32>
    %184 = vector.shape_cast %183 : vector<1x1x32xf32> to vector<1x32xf32>
    %185 = vector.shape_cast %175 : vector<1x32xf32> to vector<1x1x32xf32>
    tpu.vector_store %arg14[%c0_64, %c0_65, %c0_66], %185 {strides = array<i32>} : memref<1x1x32xf32, #tpu.memory_space<vmem>>, vector<1x1x32xf32>,
    %186 = arith.truncf %179 : vector<8x32xf32> to vector<8x32xbf16>
    %c0_67 = arith.constant 0 : index
    %c0_68 = arith.constant 0 : index
    %187 = vector.load %arg7[%c0_67, %c0_68] : memref<32x128xbf16, #tpu.memory_space<vmem>>, vector<32x128xbf16>
    %cst_69 = arith.constant dense<0.000000e+00> : vector<8x128xf32>
    %188 = tpu.matmul %186, %187, %cst_69 {dimension_numbers = #tpu.dot_dimension_numbers<[1], [0], [0], [1], [0, 0, 1, 1], [], []>} : vector<8x32xbf16>, vector<32x128xbf16>, vector<8x128xf32> -> vector<8x128xf32>
    %c0_70 = arith.constant 0 : index
    %c0_71 = arith.constant 0 : index
    %189 = vector.load %arg9[%c0_70, %c0_71] : memref<1x128xf32, #tpu.memory_space<vmem>>, vector<1x128xf32>
    %190 = vector.broadcast %189 : vector<1x128xf32> to vector<8x128xf32>
    %191 = arith.addf %188, %190 : vector<8x128xf32>
    %c0_72 = arith.constant 0 : index
    %c0_73 = arith.constant 0 : index
    %192 = vector.load %arg17[%c0_72, %c0_73] : memref<8x128xf32, #tpu.memory_space<vmem>>, vector<8x128xf32>
    tpu.vector_store %arg17[%c0_72, %c0_73], %191 {strides = array<i32>} : memref<8x128xf32, #tpu.memory_space<vmem>>, vector<8x128xf32>,
    %c0_74 = arith.constant 0 : index
    %c0_75 = arith.constant 0 : index
    %193 = vector.load %arg8[%c0_74, %c0_75] : memref<32x128xbf16, #tpu.memory_space<vmem>>, vector<32x128xbf16>
    %cst_76 = arith.constant 0.000000e+00 : f32
    %194 = vector.broadcast %cst_76 : f32 to vector<2x32xf32>
    %cst_77 = arith.constant 0.000000e+00 : f32
    %195 = vector.broadcast %cst_77 : f32 to vector<2x32xf32>
    %c0_78 = arith.constant 0 : index
    %c0_79 = arith.constant 0 : index
    %196 = vector.load %arg17[%c0_78, %c0_79] : memref<8x128xf32, #tpu.memory_space<vmem>>, vector<2x128xf32>
    %197 = arith.truncf %194 : vector<2x32xf32> to vector<2x32xbf16>
    %cst_80 = arith.constant dense<0.000000e+00> : vector<2x128xf32>
    %198 = tpu.matmul %197, %193, %cst_80 {dimension_numbers = #tpu.dot_dimension_numbers<[1], [0], [0], [1], [0, 0, 1, 1], [], []>} : vector<2x32xbf16>, vector<32x128xbf16>, vector<2x128xf32> -> vector<2x128xf32>
    %199 = arith.addf %196, %198 : vector<2x128xf32>
    %200 = arith.negf %199 : vector<2x128xf32>
    %201 = math.exp %200 : vector<2x128xf32>
    %cst_81 = arith.constant 1.000000e+00 : f32
    %202 = vector.broadcast %cst_81 : f32 to vector<2x128xf32>
    %203 = arith.addf %202, %201 : vector<2x128xf32>
    %204 = arith.divf %202, %203 : vector<2x128xf32>
    %205 = math.tanh %199 : vector<2x128xf32>
    %206 = vector.extract_strided_slice %204 {offsets = [0, 0], sizes = [2, 32], strides = [1, 1]} : vector<2x128xf32> to vector<2x32xf32>
    %207 = vector.extract_strided_slice %204 {offsets = [0, 32], sizes = [2, 32], strides = [1, 1]} : vector<2x128xf32> to vector<2x32xf32>
    %208 = vector.extract_strided_slice %205 {offsets = [0, 64], sizes = [2, 32], strides = [1, 1]} : vector<2x128xf32> to vector<2x32xf32>
    %209 = vector.extract_strided_slice %204 {offsets = [0, 96], sizes = [2, 32], strides = [1, 1]} : vector<2x128xf32> to vector<2x32xf32>
    %210 = arith.mulf %207, %195 : vector<2x32xf32>
    %211 = arith.mulf %206, %208 : vector<2x32xf32>
    %212 = arith.addf %210, %211 : vector<2x32xf32>
    %213 = math.tanh %212 : vector<2x32xf32>
    %214 = arith.mulf %209, %213 : vector<2x32xf32>
    %c0_82 = arith.constant 0 : index
    %c0_83 = arith.constant 0 : index
    %215 = vector.load %arg18[%c0_82, %c0_83] : memref<8x32xf32, #tpu.memory_space<vmem>>, vector<2x32xf32>
    tpu.vector_store %arg18[%c0_82, %c0_83], %214 {strides = array<i32>} : memref<8x32xf32, #tpu.memory_space<vmem>>, vector<2x32xf32>,
    %c2_84 = arith.constant 2 : index
    %c0_85 = arith.constant 0 : index
    %216 = vector.load %arg17[%c2_84, %c0_85] : memref<8x128xf32, #tpu.memory_space<vmem>>, vector<2x128xf32>
    %217 = arith.truncf %214 : vector<2x32xf32> to vector<2x32xbf16>
    %cst_86 = arith.constant dense<0.000000e+00> : vector<2x128xf32>
    %218 = tpu.matmul %217, %193, %cst_86 {dimension_numbers = #tpu.dot_dimension_numbers<[1], [0], [0], [1], [0, 0, 1, 1], [], []>} : vector<2x32xbf16>, vector<32x128xbf16>, vector<2x128xf32> -> vector<2x128xf32>
    %219 = arith.addf %216, %218 : vector<2x128xf32>
    %220 = arith.negf %219 : vector<2x128xf32>
    %221 = math.exp %220 : vector<2x128xf32>
    %cst_87 = arith.constant 1.000000e+00 : f32
    %222 = vector.broadcast %cst_87 : f32 to vector<2x128xf32>
    %223 = arith.addf %222, %221 : vector<2x128xf32>
    %224 = arith.divf %222, %223 : vector<2x128xf32>
    %225 = math.tanh %219 : vector<2x128xf32>
    %226 = vector.extract_strided_slice %224 {offsets = [0, 0], sizes = [2, 32], strides = [1, 1]} : vector<2x128xf32> to vector<2x32xf32>
    %227 = vector.extract_strided_slice %224 {offsets = [0, 32], sizes = [2, 32], strides = [1, 1]} : vector<2x128xf32> to vector<2x32xf32>
    %228 = vector.extract_strided_slice %225 {offsets = [0, 64], sizes = [2, 32], strides = [1, 1]} : vector<2x128xf32> to vector<2x32xf32>
    %229 = vector.extract_strided_slice %224 {offsets = [0, 96], sizes = [2, 32], strides = [1, 1]} : vector<2x128xf32> to vector<2x32xf32>
    %230 = arith.mulf %227, %212 : vector<2x32xf32>
    %231 = arith.mulf %226, %228 : vector<2x32xf32>
    %232 = arith.addf %230, %231 : vector<2x32xf32>
    %233 = math.tanh %232 : vector<2x32xf32>
    %234 = arith.mulf %229, %233 : vector<2x32xf32>
    %c2_88 = arith.constant 2 : index
    %c0_89 = arith.constant 0 : index
    %235 = vector.load %arg18[%c2_88, %c0_89] : memref<8x32xf32, #tpu.memory_space<vmem>>, vector<2x32xf32>
    tpu.vector_store %arg18[%c2_88, %c0_89], %234 {strides = array<i32>} : memref<8x32xf32, #tpu.memory_space<vmem>>, vector<2x32xf32>,
    %c4_90 = arith.constant 4 : index
    %c0_91 = arith.constant 0 : index
    %236 = vector.load %arg17[%c4_90, %c0_91] : memref<8x128xf32, #tpu.memory_space<vmem>>, vector<2x128xf32>
    %237 = arith.truncf %234 : vector<2x32xf32> to vector<2x32xbf16>
    %cst_92 = arith.constant dense<0.000000e+00> : vector<2x128xf32>
    %238 = tpu.matmul %237, %193, %cst_92 {dimension_numbers = #tpu.dot_dimension_numbers<[1], [0], [0], [1], [0, 0, 1, 1], [], []>} : vector<2x32xbf16>, vector<32x128xbf16>, vector<2x128xf32> -> vector<2x128xf32>
    %239 = arith.addf %236, %238 : vector<2x128xf32>
    %240 = arith.negf %239 : vector<2x128xf32>
    %241 = math.exp %240 : vector<2x128xf32>
    %cst_93 = arith.constant 1.000000e+00 : f32
    %242 = vector.broadcast %cst_93 : f32 to vector<2x128xf32>
    %243 = arith.addf %242, %241 : vector<2x128xf32>
    %244 = arith.divf %242, %243 : vector<2x128xf32>
    %245 = math.tanh %239 : vector<2x128xf32>
    %246 = vector.extract_strided_slice %244 {offsets = [0, 0], sizes = [2, 32], strides = [1, 1]} : vector<2x128xf32> to vector<2x32xf32>
    %247 = vector.extract_strided_slice %244 {offsets = [0, 32], sizes = [2, 32], strides = [1, 1]} : vector<2x128xf32> to vector<2x32xf32>
    %248 = vector.extract_strided_slice %245 {offsets = [0, 64], sizes = [2, 32], strides = [1, 1]} : vector<2x128xf32> to vector<2x32xf32>
    %249 = vector.extract_strided_slice %244 {offsets = [0, 96], sizes = [2, 32], strides = [1, 1]} : vector<2x128xf32> to vector<2x32xf32>
    %250 = arith.mulf %247, %232 : vector<2x32xf32>
    %251 = arith.mulf %246, %248 : vector<2x32xf32>
    %252 = arith.addf %250, %251 : vector<2x32xf32>
    %253 = math.tanh %252 : vector<2x32xf32>
    %254 = arith.mulf %249, %253 : vector<2x32xf32>
    %c4_94 = arith.constant 4 : index
    %c0_95 = arith.constant 0 : index
    %255 = vector.load %arg18[%c4_94, %c0_95] : memref<8x32xf32, #tpu.memory_space<vmem>>, vector<2x32xf32>
    tpu.vector_store %arg18[%c4_94, %c0_95], %254 {strides = array<i32>} : memref<8x32xf32, #tpu.memory_space<vmem>>, vector<2x32xf32>,
    %c6_96 = arith.constant 6 : index
    %c0_97 = arith.constant 0 : index
    %256 = vector.load %arg17[%c6_96, %c0_97] : memref<8x128xf32, #tpu.memory_space<vmem>>, vector<2x128xf32>
    %257 = arith.truncf %254 : vector<2x32xf32> to vector<2x32xbf16>
    %cst_98 = arith.constant dense<0.000000e+00> : vector<2x128xf32>
    %258 = tpu.matmul %257, %193, %cst_98 {dimension_numbers = #tpu.dot_dimension_numbers<[1], [0], [0], [1], [0, 0, 1, 1], [], []>} : vector<2x32xbf16>, vector<32x128xbf16>, vector<2x128xf32> -> vector<2x128xf32>
    %259 = arith.addf %256, %258 : vector<2x128xf32>
    %260 = arith.negf %259 : vector<2x128xf32>
    %261 = math.exp %260 : vector<2x128xf32>
    %cst_99 = arith.constant 1.000000e+00 : f32
    %262 = vector.broadcast %cst_99 : f32 to vector<2x128xf32>
    %263 = arith.addf %262, %261 : vector<2x128xf32>
    %264 = arith.divf %262, %263 : vector<2x128xf32>
    %265 = math.tanh %259 : vector<2x128xf32>
    %266 = vector.extract_strided_slice %264 {offsets = [0, 0], sizes = [2, 32], strides = [1, 1]} : vector<2x128xf32> to vector<2x32xf32>
    %267 = vector.extract_strided_slice %264 {offsets = [0, 32], sizes = [2, 32], strides = [1, 1]} : vector<2x128xf32> to vector<2x32xf32>
    %268 = vector.extract_strided_slice %265 {offsets = [0, 64], sizes = [2, 32], strides = [1, 1]} : vector<2x128xf32> to vector<2x32xf32>
    %269 = vector.extract_strided_slice %264 {offsets = [0, 96], sizes = [2, 32], strides = [1, 1]} : vector<2x128xf32> to vector<2x32xf32>
    %270 = arith.mulf %267, %252 : vector<2x32xf32>
    %271 = arith.mulf %266, %268 : vector<2x32xf32>
    %272 = arith.addf %270, %271 : vector<2x32xf32>
    %273 = math.tanh %272 : vector<2x32xf32>
    %274 = arith.mulf %269, %273 : vector<2x32xf32>
    %c6_100 = arith.constant 6 : index
    %c0_101 = arith.constant 0 : index
    %275 = vector.load %arg18[%c6_100, %c0_101] : memref<8x32xf32, #tpu.memory_space<vmem>>, vector<2x32xf32>
    tpu.vector_store %arg18[%c6_100, %c0_101], %274 {strides = array<i32>} : memref<8x32xf32, #tpu.memory_space<vmem>>, vector<2x32xf32>,
    %c0_102 = arith.constant 0 : index
    %c0_103 = arith.constant 0 : index
    %276 = vector.load %arg18[%c0_102, %c0_103] : memref<8x32xf32, #tpu.memory_space<vmem>>, vector<8x32xf32>
    %277 = arith.addf %179, %276 : vector<8x32xf32>
    %c0_104 = arith.constant 0 : index
    %c0_105 = arith.constant 0 : index
    %c0_106 = arith.constant 0 : index
    %278 = vector.load %arg15[%c0_104, %c0_105, %c0_106] : memref<1x2x32xf32, #tpu.memory_space<vmem>>, vector<1x2x32xf32>
    %279 = vector.shape_cast %278 : vector<1x2x32xf32> to vector<2x32xf32>
    %280 = vector.shape_cast %274 : vector<2x32xf32> to vector<1x2x32xf32>
    tpu.vector_store %arg15[%c0_104, %c0_105, %c0_106], %280 {strides = array<i32>} : memref<1x2x32xf32, #tpu.memory_space<vmem>>, vector<1x2x32xf32>,
    %c0_107 = arith.constant 0 : index
    %c0_108 = arith.constant 0 : index
    %c0_109 = arith.constant 0 : index
    %281 = vector.load %arg16[%c0_107, %c0_108, %c0_109] : memref<1x2x32xf32, #tpu.memory_space<vmem>>, vector<1x2x32xf32>
    %282 = vector.shape_cast %281 : vector<1x2x32xf32> to vector<2x32xf32>
    %283 = vector.shape_cast %272 : vector<2x32xf32> to vector<1x2x32xf32>
    tpu.vector_store %arg16[%c0_107, %c0_108, %c0_109], %283 {strides = array<i32>} : memref<1x2x32xf32, #tpu.memory_space<vmem>>, vector<1x2x32xf32>,
    %284 = arith.truncf %277 : vector<8x32xf32> to vector<8x32xbf16>
    %c0_110 = arith.constant 0 : index
    %c0_111 = arith.constant 0 : index
    %285 = vector.load %arg10[%c0_110, %c0_111] : memref<32x128xbf16, #tpu.memory_space<vmem>>, vector<32x128xbf16>
    %cst_112 = arith.constant dense<0.000000e+00> : vector<8x128xf32>
    %286 = tpu.matmul %284, %285, %cst_112 {dimension_numbers = #tpu.dot_dimension_numbers<[1], [0], [0], [1], [0, 0, 1, 1], [], []>} : vector<8x32xbf16>, vector<32x128xbf16>, vector<8x128xf32> -> vector<8x128xf32>
    %c0_113 = arith.constant 0 : index
    %c0_114 = arith.constant 0 : index
    %287 = vector.load %arg11[%c0_113, %c0_114] : memref<1x128xf32, #tpu.memory_space<vmem>>, vector<1x128xf32>
    %288 = vector.broadcast %287 : vector<1x128xf32> to vector<8x128xf32>
    %289 = arith.addf %286, %288 : vector<8x128xf32>
    %c0_115 = arith.constant 0 : index
    %c0_116 = arith.constant 0 : index
    %c0_117 = arith.constant 0 : index
    %290 = vector.load %arg12[%c0_115, %c0_116, %c0_117] : memref<1x8x128xf32, #tpu.memory_space<vmem>>, vector<1x8x128xf32>
    %291 = vector.shape_cast %290 : vector<1x8x128xf32> to vector<8x128xf32>
    %292 = vector.shape_cast %289 : vector<8x128xf32> to vector<1x8x128xf32>
    tpu.vector_store %arg12[%c0_115, %c0_116, %c0_117], %292 {strides = array<i32>} : memref<1x8x128xf32, #tpu.memory_space<vmem>>, vector<1x8x128xf32>,
    return
  }
  func.func @transform_0(%arg0: i32) -> (i32, i32, i32) {
    %c0_i32 = arith.constant 0 : i32
    %c0_i32_0 = arith.constant 0 : i32
    %c0_i32_1 = arith.constant 0 : i32
    return %arg0, %c0_i32, %c0_i32_0 : i32, i32, i32
  }
  func.func @transform_1(%arg0: i32) -> (i32, i32, i32) {
    %c0_i32 = arith.constant 0 : i32
    %c0_i32_0 = arith.constant 0 : i32
    %c0_i32_1 = arith.constant 0 : i32
    return %arg0, %c0_i32, %c0_i32_0 : i32, i32, i32
  }
  func.func @transform_2(%arg0: i32) -> (i32, i32) {
    %c0_i32 = arith.constant 0 : i32
    %c0_i32_0 = arith.constant 0 : i32
    %c0_i32_1 = arith.constant 0 : i32
    return %c0_i32, %c0_i32_0 : i32, i32
  }
  func.func @transform_3(%arg0: i32) -> (i32, i32) {
    %c0_i32 = arith.constant 0 : i32
    %c0_i32_0 = arith.constant 0 : i32
    %c0_i32_1 = arith.constant 0 : i32
    return %c0_i32, %c0_i32_0 : i32, i32
  }
  func.func @transform_4(%arg0: i32) -> (i32, i32) {
    %c0_i32 = arith.constant 0 : i32
    %c0_i32_0 = arith.constant 0 : i32
    %c0_i32_1 = arith.constant 0 : i32
    return %c0_i32, %c0_i32_0 : i32, i32
  }
  func.func @transform_5(%arg0: i32) -> (i32, i32) {
    %c0_i32 = arith.constant 0 : i32
    %c0_i32_0 = arith.constant 0 : i32
    %c0_i32_1 = arith.constant 0 : i32
    return %c0_i32, %c0_i32_0 : i32, i32
  }
  func.func @transform_6(%arg0: i32) -> (i32, i32) {
    %c0_i32 = arith.constant 0 : i32
    %c0_i32_0 = arith.constant 0 : i32
    %c0_i32_1 = arith.constant 0 : i32
    return %c0_i32, %c0_i32_0 : i32, i32
  }
  func.func @transform_7(%arg0: i32) -> (i32, i32) {
    %c0_i32 = arith.constant 0 : i32
    %c0_i32_0 = arith.constant 0 : i32
    %c0_i32_1 = arith.constant 0 : i32
    return %c0_i32, %c0_i32_0 : i32, i32
  }
  func.func @transform_8(%arg0: i32) -> (i32, i32) {
    %c0_i32 = arith.constant 0 : i32
    %c0_i32_0 = arith.constant 0 : i32
    %c0_i32_1 = arith.constant 0 : i32
    return %c0_i32, %c0_i32_0 : i32, i32
  }
  func.func @transform_9(%arg0: i32) -> (i32, i32) {
    %c0_i32 = arith.constant 0 : i32
    %c0_i32_0 = arith.constant 0 : i32
    %c0_i32_1 = arith.constant 0 : i32
    return %c0_i32, %c0_i32_0 : i32, i32
  }
  func.func @transform_10(%arg0: i32) -> (i32, i32) {
    %c0_i32 = arith.constant 0 : i32
    %c0_i32_0 = arith.constant 0 : i32
    %c0_i32_1 = arith.constant 0 : i32
    return %c0_i32, %c0_i32_0 : i32, i32
  }
  func.func @transform_11(%arg0: i32) -> (i32, i32, i32) {
    %c0_i32 = arith.constant 0 : i32
    %c0_i32_0 = arith.constant 0 : i32
    %c0_i32_1 = arith.constant 0 : i32
    return %arg0, %c0_i32, %c0_i32_0 : i32, i32, i32
  }
  func.func @transform_12(%arg0: i32) -> (i32, i32, i32) {
    %c0_i32 = arith.constant 0 : i32
    %c0_i32_0 = arith.constant 0 : i32
    %c0_i32_1 = arith.constant 0 : i32
    return %arg0, %c0_i32, %c0_i32_0 : i32, i32, i32
  }
  func.func @transform_13(%arg0: i32) -> (i32, i32, i32) {
    %c0_i32 = arith.constant 0 : i32
    %c0_i32_0 = arith.constant 0 : i32
    %c0_i32_1 = arith.constant 0 : i32
    return %arg0, %c0_i32, %c0_i32_0 : i32, i32, i32
  }
  func.func @transform_14(%arg0: i32) -> (i32, i32, i32) {
    %c0_i32 = arith.constant 0 : i32
    %c0_i32_0 = arith.constant 0 : i32
    %c0_i32_1 = arith.constant 0 : i32
    return %arg0, %c0_i32, %c0_i32_0 : i32, i32, i32
  }
  func.func @transform_15(%arg0: i32) -> (i32, i32, i32) {
    %c0_i32 = arith.constant 0 : i32
    %c0_i32_0 = arith.constant 0 : i32
    %c0_i32_1 = arith.constant 0 : i32
    return %arg0, %c0_i32, %c0_i32_0 : i32, i32, i32
  }
}

</mosaic_0001>

<bundles_post_ra>
// kernel: model_forward.1
= control target key start
LH: loop header
LB: loop body
LE: loop exit
PB: predicated region body
PF: predicated region fallthrough
CT: control target
= control target key end

     0   :  { %s3346_s0 = inlined_call_operand.vmem [shape: f32[2,8,128], index: 0, kind: input, shape index: {}]   ;;  %s3347_s1 = inlined_call_operand.vmem [shape: f32[2,1,4], index: 1, kind: input, shape index: {}]   ;;  %s3348_s2 = inlined_call_operand.vmem [shape: bf16[4,128], index: 2, kind: input, shape index: {}]   ;;  %s3349_s3 = inlined_call_operand.vmem [shape: bf16[128,128], index: 3, kind: input, shape index: {}]   ;;  %s3350_s4 = inlined_call_operand.vmem [shape: bf16[32,128], index: 4, kind: input, shape index: {}]   ;;  %s3351_s5 = inlined_call_operand.vmem [shape: f32[1,128], index: 5, kind: input, shape index: {}]   ;;  %s3352_s6 = inlined_call_operand.vmem [shape: bf16[32,128], index: 6, kind: input, shape index: {}]   ;;  %s3353_s7 = inlined_call_operand.vmem [shape: bf16[32,128], index: 7, kind: input, shape index: {}]   ;;  %s3354_s8 = inlined_call_operand.vmem [shape: f32[1,128], index: 8, kind: input, shape index: {}]   ;;  %s3355_s9 = inlined_call_operand.vmem [shape: bf16[32,128], index: 9, kind: input, shape index: {}]   ;;  %s3356_s10 = inlined_call_operand.vmem [shape: f32[1,128], index: 10, kind: input, shape index: {}]   ;;  %s3357_s11 = inlined_call_operand.hbm [shape: f32[2,8,128], index: 11, kind: output, shape index: {0}]   ;;  %s3358_s12 = inlined_call_operand.hbm [shape: f32[2,1,32], index: 12, kind: output, shape index: {1}]   ;;  %s3359_s13 = inlined_call_operand.hbm [shape: f32[2,1,32], index: 13, kind: output, shape index: {2}]   ;;  %s3360_s14 = inlined_call_operand.hbm [shape: f32[2,2,32], index: 14, kind: output, shape index: {3}]   ;;  %s3361_s15 = inlined_call_operand.hbm [shape: f32[2,2,32], index: 15, kind: output, shape index: {4}]  }
   0x1   :  { %3369 = sst [smem:[#allocation19_spill]] %s3346_s0 }
   0x2   :  { %3370 = sst [smem:[#allocation20_spill]] %s3347_s1 }
   0x3   :  { %3371 = sst [smem:[#allocation21_spill]] %s3348_s2 }
   0x4   :  { %3372 = sst [smem:[#allocation22_spill]] %s3349_s3 }
   0x5   :  { %3373 = sst [smem:[#allocation23_spill]] %s3350_s4 }
   0x6   :  { %3374 = sst [smem:[#allocation24_spill]] %s3351_s5 }
   0x7   :  { %3375 = sst [smem:[#allocation25_spill]] %s3352_s6 }
   0x8   :  { %21 = vsyncpa [#allocation5], 0 }
   0x9   :  { %23 = vsyncpa [#allocation5 + $0x1], 0 }
   0xa   :  { %24 = vsyncpa [#allocation7], 0 }
   0xb   :  { %26 = vsyncpa [#allocation7 + $0x1], 0 }
   0xc   :  { %27 = vsyncpa [#allocation10], 0 }
   0xd   :  { %29 = vsyncpa [#allocation10 + $0x1], 0  ;;  %s2790_s18 = smov 0   ;;  %s2792_s19 = smov 0  }
   0xe   :  { %s2794_s20 = smov 0   ;;  %s2796_s21 = smov 0  }
   0xf LB: > { %3376 = sst [smem:[#allocation15_spill]] %s2693_s20  ;;  %s2811_s22 = sadd.s32 4294967295, %s2697_s21   ;;  %s2697_s21 = sphi %s2796_s21, %s3394_s21   ;;  %s2693_s20 = sphi %s2794_s20, %s3399_s20   ;;  %s2689_s19 = sphi %s2792_s19, %s3398_s19   ;;  %s2685_s18 = sphi %s2790_s18, %s3397_s18  }
  0x10   : > { %s3362_s23 = sadd.s32 4294967294, %s2697_s21   ;;  %s2815_s24 = sadd.s32 1, %s2697_s21  }
  0x11   : > { %3377 = sst [smem:[#allocation16_spill]] %s2815_s24  ;;  %s283_s25 = sadd.s32 1, %s2693_s20 }
  0x12   : > { %s280_s26 = ssub.s32 %s2697_s21, %s2815_s24  ;;  %p293_p0 = scmp.ne.s32.totalorder %s2693_s20, %s2689_s19 }
  0x13   : > { %p281_p1 = scmp.eq.s32.totalorder %s280_s26, 0  ;;  %p294_p2 = scmp.eq.s32.totalorder %s2811_s22, 1 }
  0x14   : > { %p299_p3 = scmp.ne.s32.totalorder %s2689_s19, %s2685_s18  ;;  %p300_p4 = scmp.eq.s32.totalorder %s3362_s23, 1 }
  0x15   : > { %s2828_s27 = scalar_select %p281_p1, %s2693_s20, %s283_s25  }
  0x16   : > { %p2830_p5 = por %p294_p2, %p293_p0  ;;  %p2834_p6 = por %p300_p4, %p299_p3 }
  0x17   : > { %3378 = sst [smem:[#allocation17_spill]] %s2828_s27  ;;  %p2088_p7 = scmp.ge.s32.totalorder %s2697_s21, 1 }
  0x18   : > { %s3380_s29 = scalar_select %p2834_p6, 1, 0 }
  0x19   : > { %p462_p8 = scmp.lt.s32.totalorder %s2697_s21, 3 }
  0x1a   : > { %3381 = sst [smem:[#allocation18_spill]] %s3380_s29 }
  0x1b   : > { %p463_p9 = pnand %p2088_p7, %p462_p8 }
  0x1c   : > { %s3382_s3 = sld [smem:[#allocation22_spill]] (!%p463_p9)  ;;  %v2699_v1 = vmov (!%p463_p9), 0.0   ;;  %vm2700_vm0 = vmmov (!%p463_p9), 0   ;;  %p530_p10 = scmp.lt.s32.totalorder (!%p463_p9), %s2811_s22, 1  ;;  %vm545_vm1 = vcmask (!%p463_p9), 1041408   ;;  %vm541_vm2 = vcmask (!%p463_p9), 31744  }
  0x1d   : > { %466 = sbr.rel (%p463_p9) target bundleno = 8782 (0x224e), region = 64  ;;  %2206 = vmatprep.subr.bf16.mxu1 (!%p463_p9), %v2699_v1  ;;  %2200 = vmatprep.subr.bf16.mxu0 (!%p463_p9), %v2699_v1  ;;  %s3383_s2 = sld [smem:[#allocation21_spill]] (!%p463_p9)  ;;  %v2701_v13 = vmov (!%p463_p9), 0   ;;  %v702_v22 = vlaneseq (!%p463_p9)  ;;  %vm725_vm3 = vcmask (!%p463_p9), 261120   ;;  %vm798_vm4 = vcmask (!%p463_p9), 253952  }
  0x1e   : > { %2202 = vmatprep.mubr.msk.bf16.mxu0 (!%p463_p9), %vm2700_vm0, %v2699_v1  ;;  %2222 = vmatprep.mubr.msk.bf16.mxu1 (!%p463_p9), %vm2700_vm0, %v2699_v1  ;;  %s3384_s1 = sld [smem:[#allocation20_spill]] (!%p463_p9)  ;;  %s3385_s4 = sld [smem:[#allocation23_spill]] (!%p463_p9)  ;;  %vm1507_vm5 = vcmask (!%p463_p9), 254976  }
  0x1f   : > { %s3386_s0 = sld [smem:[#allocation19_spill]] (!%p463_p9)  ;;  %v703_v27 = vshrl.u32 (!%p463_p9), %v702_v22, 7  ;;  %s3387_s5 = sld [smem:[#allocation24_spill]] (!%p463_p9) }
  0x20   : > { %s2703_s30 = smov (!%p463_p9), 32   ;;  %s3388_s6 = sld [smem:[#allocation25_spill]] (!%p463_p9) }
  0x21   : > { %v704_v28 = vsub.s32 (!%p463_p9), 0, %v703_v27  ;;  %s3076_s16 = sand.u32 (!%p463_p9), 1, %s2689_s19   ;;  %s2704_s24 = smov (!%p463_p9), 96  }
  0x22   : > { %v2403_v0 = vld [vmem:[%s3382_s3] sm:$0xff] (!%p463_p9)   ;;  %v2404_v2 = vld [vmem:[%s3382_s3 + $0x8] sm:$0xff] (!%p463_p9)   ;;  %v2405_v3 = vld [vmem:[%s3382_s3 + $0x10] sm:$0xff] (!%p463_p9)   ;;  %s3367_s23 = scalar_lea.vmem (!%p463_p9), [#allocation6], %s3076_s16  ;;  %s515_s27 = scalar_lea.vmem (!%p463_p9), [#allocation8], %s3076_s16 }
  0x23   : > { %2207 = vmatpush3.bf16.msra.mxu1 (!%p463_p9), %v2403_v0  ;;  %v540_v4 = vld [vmem:[%s3383_s2] sm:$0x3] (!%p463_p9)  ;;  %v2406_v9 = vld [vmem:[%s3382_s3 + $0x18] sm:$0xff] (!%p463_p9)   ;;  %v2408_v12 = vld [vmem:[%s3382_s3 + $0x28] sm:$0xff] (!%p463_p9)   ;;  %s1824_s17 = sand.u32 (!%p463_p9), 1, %s2811_s22  }
  0x24   : > { %2208 = vmatprep.subr.bf16.mxu1 %v2699_v1  ;;  %s2855_s26 = scalar_select %p530_p10, %s2811_s22, 1  ;;  %v547_v5 = vsel %vm545_vm1, %v540_v4, 0  ;;  %v2871_v7 = vld [vmem:[%s3385_s4] sm:$0xff]   ;;  %v2881_v10 = vld [vmem:[%s3385_s4 + $0x8] sm:$0xff]   ;;  %v2409_v14 = vld [vmem:[%s3382_s3 + $0x30] sm:$0xff]  }
  0x25   : > { %2201 = vmatpush3.bf16.msra.mxu0 %v547_v5  ;;  %v2407_v11 = vld [vmem:[%s3382_s3 + $0x20] sm:$0xff]   ;;  %v2410_v15 = vld [vmem:[%s3382_s3 + $0x38] sm:$0xff]   ;;  %s3177_s3 = scalar_lea.sflag [#allocation7], %s1824_s17 }
  0x26   : > { %s536_s20 = scalar_lea.vmem %s3384_s1, %s2855_s26  ;;  %2226 = vmatprep.subr.bf16.mxu0 %v2699_v1  ;;  %s2092_s25 = sshll.u32 %s2855_s26, 3  ;;  %v2094_v29 = vld [vmem:[%s3387_s5] ss:$0 sm:$0xff] }
  0x27   : > { %2209 = vmatpush3.bf16.msra.mxu1 %v2404_v2  ;;  %v538_v6 = vld [vmem:[%s536_s20] sm:$0x1]  ;;  %s533_s26 = scalar_lea.vmem %s3386_s0, %s2092_s25  ;;  %s2702_s25 = smov 64  }
  0x28   : > { %2210 = vmatprep.subr.bf16.mxu1 %v2699_v1  ;;  %v539_v8 = vpack.c.bf16 %v538_v6, %v538_v6  ;;  %v589_v16 = vld [vmem:[%s533_s26] sm:$0xff]  ;;  %s3368_s20 = sshll.u32 %s2811_s22, 4  ;;  %s3389_s1 = scalar_lea.vmem [#allocation6], %s3076_s16 }
  0x29   : > { %v590_v17 = vpack.c.bf16 %v589_v16, %v589_v16  ;;  %s1864_s2 = sshll.u32 %s3389_s1, 4  ;;  %s1865_s2 = int_to_ptr.vmem [resolvable:$true] %s1864_s2 }
  0x2a   : > { %2203 = vmatmul.mubr.msk.bf16.vlgmr.msra.gmra.mrb[0].mxu0 %vm541_vm2, %v539_v8  ;;  %s2515_s4 = scalar_lea.vmem %s1865_s2, 16 }
  0x2b   : > { %2211 = vmatpush3.bf16.msra.mxu1 %v2405_v3  ;;  %2227 = vmatpush3.bf16.msra.mxu0 %v2871_v7  ;;  %p2516_p11 = scmp.ne.s32.totalorder %s1865_s2, %s2515_s4 }
  0x2c   : > { %2212 = vmatprep.subr.bf16.mxu1 %v2699_v1  ;;  %2230 = vmatprep.mubr.msk.bf16.mxu0 %vm2700_vm0, %v2699_v1 }
  0x2d   : > { %2228 = vmatprep.subr.bf16.mxu0 %v2699_v1  ;;  %p2517_p12 = pnand %p2516_p11, %p2830_p5 }
  0x2f   : > { %2213 = vmatpush3.bf16.msra.mxu1 %v2406_v9  ;;  %2229 = vmatpush3.bf16.msra.mxu0 %v2881_v10  ;;  %p2518_p13 = pneg %p2517_p12 }
  0x30   : > { %2214 = vmatprep.subr.bf16.mxu1 %v2699_v1  ;;  %2234 = vmatprep.subr.bf16.mxu0 %v2699_v1 }
  0x32   : > { %2231 = vmatmul.mubr.bf16.vlgmr.msra.gmra.mrb[4].mxu0 %v2701_v13 }
  0x33   : > { %2215 = vmatpush3.bf16.msra.mxu1 %v2407_v11  ;;  %2235 = vmatpush3.bf16.msra.mxu0 %v2871_v7 }
  0x34   : > { %2216 = vmatprep.subr.bf16.mxu1 %v2699_v1  ;;  %2238 = vmatprep.mubr.msk.bf16.mxu0 %vm2700_vm0, %v2699_v1 }
  0x35   : > { %2236 = vmatprep.subr.bf16.mxu0 %v2699_v1 }
  0x37   : > { %2217 = vmatpush3.bf16.msra.mxu1 %v2408_v12  ;;  %2237 = vmatpush3.bf16.msra.mxu0 %v2881_v10 }
  0x38   : > { %2218 = vmatprep.subr.bf16.mxu1 %v2699_v1  ;;  %2242 = vmatprep.subr.bf16.mxu0 %v2699_v1 }
  0x3b   : > { %2219 = vmatpush3.bf16.msra.mxu1 %v2409_v14 }
  0x3c   : > { %2220 = vmatprep.subr.bf16.mxu1 %v2699_v1 }
  0x3f   : > { %2221 = vmatpush3.bf16.msra.mxu1 %v2410_v15 }
  0x40   : > { %2258 = vmatprep.subr.bf16.mxu1 %v2699_v1 }
  0x42   : > { %2223 = vmatmul.mubr.bf16.vlgmr.msra.gmra.mrb[0].mxu1 %v590_v17 }
  0x43   : > { %2259 = vmatpush3.bf16.msra.mxu1 %v2871_v7  ;;  %2262 = vmatprep.mubr.msk.bf16.mxu1 %vm2700_vm0, %v2699_v1 }
  0x44   : > { %2260 = vmatprep.subr.bf16.mxu1 %v2699_v1 }
  0x47   : > { %2261 = vmatpush3.bf16.msra.mxu1 %v2881_v10 }
  0x48   : > { %2274 = vmatprep.subr.bf16.mxu1 %v2699_v1 }
  0xfd   : > { %v583_v18 = vpop.f32.mrb[0].mxu0 }
  0xfe   : > { %v2204_v19 = vpop.f32.mrb[1].mxu0  ;;  %v705_v30 = vrot.slane %v583_v18, %v704_v28 }
  0xff   : > { %v586_v20 = vpop.f32.mrb[2].mxu0 }
 0x100   : > { %v2205_v21 = vpop.f32.mrb[3].mxu0 }
 0x105   : > { %v763_v23 = vpop.f32.mrb[4].mxu0 }
 0x106   : > { %v2232_v24 = vpop.f32.mrb[5].mxu0 }
 0x107   : > { %v766_v25 = vpop.f32.mrb[6].mxu0 }
 0x108   : > { %v2233_v26 = vpop.f32.mrb[7].mxu0 }
 0x115   : > { %v696_v31 = vpop.f32.mrb[0].mxu1 }
 0x116   : > { %v697_v32 = vadd.f32 %v2094_v29, %v696_v31  ;;  %v2224_v33 = vpop.f32.mrb[1].mxu1 }
 0x117   : > { %v699_v34 = vpop.f32.mrb[2].mxu1 }
 0x118   : > { %v706_v35 = vadd.f32 %v705_v30, %v697_v32  ;;  %v2225_v36 = vpop.f32.mrb[3].mxu1 }
 0x11a   : > { %707 = vst [vmem:[#allocation2] sm:$0xff] %v706_v35 }
 0x121   : > { %v712_v37 = vld [vmem:[#allocation2] sm:$0x1]  ;;  %v800_v54 = vld [vmem:[#allocation2 + $0x1] sm:$0x1]  ;;  %v878_v15 = vld [vmem:[#allocation2 + $0x2] sm:$0x1] }
 0x122   : > { %v769_v38 = vadd.f32 %v763_v23, %v712_v37  ;;  %v956_v36 = vld [vmem:[#allocation2 + $0x3] sm:$0x1] }
 0x124   : > { %2419 = vtanh.f32 %v769_v38  ;;  %v2105_v40 = vmul.f32 -1.442695, %v769_v38 }
 0x126   : > { %2421 = vpow2.f32 %v2105_v40 }
 0x12e   : > { %v2420_v39 = vpop.eup %2419 }
 0x12f   : > { %779 = vrot.lane.b32.xlu0 %v2420_v39, %s2702_s25 }
 0x130   : > { %v2422_v41 = vpop.eup %2421 }
 0x131   : > { %v773_v42 = vadd.f32 1.0, %v2422_v41 }
 0x133   : > { %2423 = vrcp.f32 %v773_v42 }
 0x13d   : > { %v2424_v43 = vpop.eup %2423 }
 0x13e   : > { %v777_v46 = vmul.f32 0.0, %v2424_v43 }
 0x1a1   : > { %v780_v44 = vpop.permute.xlu0 %779 }
 0x1a2   : > { %v782_v45 = vmul.f32 %v2424_v43, %v780_v44 }
 0x1a4   : > { %784 = vrot.lane.b32.xlu0 %v782_v45, %s2703_s30 }
 0x216   : > { %v785_v47 = vpop.permute.xlu0 %784 }
 0x217   : > { %v787_v48 = vadd.f32 %v785_v47, %v777_v46 }
 0x219   : > { %2425 = vtanh.f32 %v787_v48 }
 0x223   : > { %v2426_v49 = vpop.eup %2425 }
 0x224   : > { %790 = vrot.lane.b32.xlu1 %v2426_v49, %s2702_s25 }
 0x296   : > { %v791_v50 = vpop.permute.xlu1 %790 }
 0x297   : > { %v2929_v51 = vmul.f32 %v2424_v43, %v791_v50 }
 0x299   : > { %v801_v52 = vpack.c.bf16 %v2929_v51, %v2929_v51 }
 0x29b   : > { %803 = vrot.lane.b32.xlu1 %v801_v52, %s2703_s30 }
 0x30d   : > { %v804_v53 = vpop.permute.xlu1 %803 }
 0x30e   : > { %2239 = vmatmul.mubr.msk.bf16.vlgmr.msra.gmra.mrb[8].mxu0 %vm725_vm3, %v804_v53 }
 0x30f   : > { %2243 = vmatpush3.bf16.msra.mxu0 %v2871_v7  ;;  %2246 = vmatprep.mubr.msk.bf16.mxu0 %vm2700_vm0, %v2699_v1 }
 0x310   : > { %2244 = vmatprep.subr.bf16.mxu0 %v2699_v1 }
 0x313   : > { %2245 = vmatpush3.bf16.msra.mxu0 %v2881_v10 }
 0x314   : > { %2250 = vmatprep.subr.bf16.mxu0 %v2699_v1 }
 0x3e1   : > { %v842_v55 = vpop.f32.mrb[8].mxu0 }
 0x3e2   : > { %v848_v56 = vadd.f32 %v842_v55, %v800_v54  ;;  %v2240_v57 = vpop.f32.mrb[9].mxu0 }
 0x3e3   : > { %v845_v58 = vpop.f32.mrb[10].mxu0 }
 0x3e4   : > { %2427 = vtanh.f32 %v848_v56  ;;  %v2241_v59 = vpop.f32.mrb[11].mxu0  ;;  %v2107_v61 = vmul.f32 -1.442695, %v848_v56  ;;  %v1034_v58 = vld [vmem:[#allocation2 + $0x4] sm:$0x1] }
 0x3e6   : > { %2429 = vpow2.f32 %v2107_v61 }
 0x3ee   : > { %v2428_v60 = vpop.eup %2427 }
 0x3ef   : > { %858 = vrot.lane.b32.xlu0 %v2428_v60, %s2702_s25 }
 0x3f0   : > { %v2430_v62 = vpop.eup %2429 }
 0x3f1   : > { %v852_v63 = vadd.f32 1.0, %v2430_v62 }
 0x3f3   : > { %2431 = vrcp.f32 %v852_v63 }
 0x3fd   : > { %v2432_v0 = vpop.eup %2431 }
 0x3fe   : > { %v856_v4 = vmul.f32 %v2432_v0, %v787_v48 }
 0x461   : > { %v859_v2 = vpop.permute.xlu0 %858 }
 0x462   : > { %v861_v3 = vmul.f32 %v2432_v0, %v859_v2 }
 0x464   : > { %863 = vrot.lane.b32.xlu1 %v861_v3, %s2703_s30 }
 0x4d6   : > { %v864_v5 = vpop.permute.xlu1 %863 }
 0x4d7   : > { %v866_v6 = vadd.f32 %v864_v5, %v856_v4 }
 0x4d9   : > { %2433 = vtanh.f32 %v866_v6 }
 0x4e3   : > { %v2434_v8 = vpop.eup %2433 }
 0x4e4   : > { %869 = vrot.lane.b32.xlu0 %v2434_v8, %s2702_s25 }
 0x556   : > { %v870_v9 = vpop.permute.xlu0 %869 }
 0x557   : > { %v2944_v11 = vmul.f32 %v2432_v0, %v870_v9 }
 0x559   : > { %v879_v12 = vpack.c.bf16 %v2944_v11, %v2944_v11 }
 0x55b   : > { %881 = vrot.lane.b32.xlu1 %v879_v12, %s2703_s30 }
 0x5cd   : > { %v882_v14 = vpop.permute.xlu1 %881 }
 0x5ce   : > { %2247 = vmatmul.mubr.msk.bf16.vlgmr.msra.gmra.mrb[12].mxu0 %vm725_vm3, %v882_v14 }
 0x5cf   : > { %2251 = vmatpush3.bf16.msra.mxu0 %v2871_v7  ;;  %2254 = vmatprep.mubr.msk.bf16.mxu0 %vm2700_vm0, %v2699_v1 }
 0x5d0   : > { %2252 = vmatprep.subr.bf16.mxu0 %v2699_v1 }
 0x5d3   : > { %2253 = vmatpush3.bf16.msra.mxu0 %v2881_v10 }
 0x5d4   : > { %2266 = vmatprep.subr.bf16.mxu0 %v2699_v1 }
 0x6a1   : > { %v920_v16 = vpop.f32.mrb[12].mxu0 }
 0x6a2   : > { %v926_v17 = vadd.f32 %v920_v16, %v878_v15  ;;  %v2248_v18 = vpop.f32.mrb[13].mxu0 }
 0x6a3   : > { %v923_v19 = vpop.f32.mrb[14].mxu0 }
 0x6a4   : > { %2435 = vtanh.f32 %v926_v17  ;;  %v2249_v20 = vpop.f32.mrb[15].mxu0  ;;  %v2109_v22 = vmul.f32 -1.442695, %v926_v17 }
 0x6a5   : > { %v1112_v20 = vld [vmem:[#allocation2 + $0x5] sm:$0x1] }
 0x6a6   : > { %2437 = vpow2.f32 %v2109_v22 }
 0x6ae   : > { %v2436_v21 = vpop.eup %2435 }
 0x6af   : > { %936 = vrot.lane.b32.xlu0 %v2436_v21, %s2702_s25 }
 0x6b0   : > { %v2438_v23 = vpop.eup %2437 }
 0x6b1   : > { %v930_v24 = vadd.f32 1.0, %v2438_v23 }
 0x6b3   : > { %2439 = vrcp.f32 %v930_v24 }
 0x6bd   : > { %v2440_v25 = vpop.eup %2439 }
 0x6be   : > { %v934_v28 = vmul.f32 %v2440_v25, %v866_v6 }
 0x721   : > { %v937_v26 = vpop.permute.xlu0 %936 }
 0x722   : > { %v939_v27 = vmul.f32 %v2440_v25, %v937_v26 }
 0x724   : > { %941 = vrot.lane.b32.xlu1 %v939_v27, %s2703_s30 }
 0x796   : > { %v942_v29 = vpop.permute.xlu1 %941 }
 0x797   : > { %v944_v30 = vadd.f32 %v942_v29, %v934_v28 }
 0x799   : > { %2441 = vtanh.f32 %v944_v30 }
 0x7a3   : > { %v2442_v31 = vpop.eup %2441 }
 0x7a4   : > { %947 = vrot.lane.b32.xlu0 %v2442_v31, %s2702_s25 }
 0x816   : > { %v948_v32 = vpop.permute.xlu0 %947 }
 0x817   : > { %v2959_v33 = vmul.f32 %v2440_v25, %v948_v32 }
 0x819   : > { %v957_v34 = vpack.c.bf16 %v2959_v33, %v2959_v33 }
 0x81b   : > { %959 = vrot.lane.b32.xlu1 %v957_v34, %s2703_s30 }
 0x88d   : > { %v960_v35 = vpop.permute.xlu1 %959 }
 0x88e   : > { %2255 = vmatmul.mubr.msk.bf16.vlgmr.msra.gmra.mrb[16].mxu0 %vm725_vm3, %v960_v35 }
 0x88f   : > { %2267 = vmatpush3.bf16.msra.mxu0 %v2871_v7  ;;  %2270 = vmatprep.mubr.msk.bf16.mxu0 %vm2700_vm0, %v2699_v1 }
 0x890   : > { %2268 = vmatprep.subr.bf16.mxu0 %v2699_v1 }
 0x893   : > { %2269 = vmatpush3.bf16.msra.mxu0 %v2881_v10 }
 0x894   : > { %2282 = vmatprep.subr.bf16.mxu0 %v2699_v1 }
 0x961   : > { %v998_v37 = vpop.f32.mrb[16].mxu0 }
 0x962   : > { %v1004_v38 = vadd.f32 %v998_v37, %v956_v36  ;;  %v2256_v39 = vpop.f32.mrb[17].mxu0 }
 0x963   : > { %v1001_v40 = vpop.f32.mrb[18].mxu0 }
 0x964   : > { %2443 = vtanh.f32 %v1004_v38  ;;  %v2257_v41 = vpop.f32.mrb[19].mxu0  ;;  %v2111_v43 = vmul.f32 -1.442695, %v1004_v38  ;;  %v1190_v40 = vld [vmem:[#allocation2 + $0x6] sm:$0x1] }
 0x966   : > { %2445 = vpow2.f32 %v2111_v43 }
 0x96e   : > { %v2444_v42 = vpop.eup %2443 }
 0x96f   : > { %1014 = vrot.lane.b32.xlu0 %v2444_v42, %s2702_s25 }
 0x970   : > { %v2446_v44 = vpop.eup %2445 }
 0x971   : > { %v1008_v45 = vadd.f32 1.0, %v2446_v44 }
 0x973   : > { %2447 = vrcp.f32 %v1008_v45 }
 0x97d   : > { %v2448_v46 = vpop.eup %2447 }
 0x97e   : > { %v1012_v49 = vmul.f32 %v2448_v46, %v944_v30 }
 0x9e1   : > { %v1015_v47 = vpop.permute.xlu0 %1014 }
 0x9e2   : > { %v1017_v48 = vmul.f32 %v2448_v46, %v1015_v47 }
 0x9e4   : > { %1019 = vrot.lane.b32.xlu1 %v1017_v48, %s2703_s30 }
 0xa56   : > { %v1020_v50 = vpop.permute.xlu1 %1019 }
 0xa57   : > { %v1022_v52 = vadd.f32 %v1020_v50, %v1012_v49 }
 0xa59   : > { %2449 = vtanh.f32 %v1022_v52 }
 0xa63   : > { %v2450_v53 = vpop.eup %2449 }
 0xa64   : > { %1025 = vrot.lane.b32.xlu0 %v2450_v53, %s2702_s25 }
 0xad6   : > { %v1026_v54 = vpop.permute.xlu0 %1025 }
 0xad7   : > { %v2974_v55 = vmul.f32 %v2448_v46, %v1026_v54 }
 0xad9   : > { %v1035_v56 = vpack.c.bf16 %v2974_v55, %v2974_v55 }
 0xadb   : > { %1037 = vrot.lane.b32.xlu1 %v1035_v56, %s2703_s30 }
 0xb4d   : > { %v1038_v57 = vpop.permute.xlu1 %1037 }
 0xb4e   : > { %2263 = vmatmul.mubr.msk.bf16.vlgmr.msra.gmra.mrb[4].mxu1 %vm725_vm3, %v1038_v57 }
 0xb4f   : > { %2275 = vmatpush3.bf16.msra.mxu1 %v2871_v7  ;;  %2278 = vmatprep.mubr.msk.bf16.mxu1 %vm2700_vm0, %v2699_v1 }
 0xb50   : > { %2276 = vmatprep.subr.bf16.mxu1 %v2699_v1 }
 0xb53   : > { %2277 = vmatpush3.bf16.msra.mxu1 %v2881_v10 }
 0xb54   : > { %2290 = vmatprep.subr.bf16.mxu1 %v2699_v1 }
 0xc21   : > { %v1076_v59 = vpop.f32.mrb[4].mxu1 }
 0xc22   : > { %v1082_v60 = vadd.f32 %v1076_v59, %v1034_v58  ;;  %v2264_v61 = vpop.f32.mrb[5].mxu1 }
 0xc23   : > { %v1079_v62 = vpop.f32.mrb[6].mxu1 }
 0xc24   : > { %2451 = vtanh.f32 %v1082_v60  ;;  %v2265_v63 = vpop.f32.mrb[7].mxu1  ;;  %v2113_v2 = vmul.f32 -1.442695, %v1082_v60 }
 0xc25   : > { %v1268_v63 = vld [vmem:[#allocation2 + $0x7] sm:$0x1] }
 0xc26   : > { %2453 = vpow2.f32 %v2113_v2 }
 0xc2e   : > { %v2452_v0 = vpop.eup %2451 }
 0xc2f   : > { %1092 = vrot.lane.b32.xlu0 %v2452_v0, %s2702_s25 }
 0xc30   : > { %v2454_v3 = vpop.eup %2453 }
 0xc31   : > { %v1086_v4 = vadd.f32 1.0, %v2454_v3 }
 0xc33   : > { %2455 = vrcp.f32 %v1086_v4 }
 0xc3d   : > { %v2456_v5 = vpop.eup %2455 }
 0xc3e   : > { %v1090_v9 = vmul.f32 %v2456_v5, %v1022_v52 }
 0xca1   : > { %v1093_v6 = vpop.permute.xlu0 %1092 }
 0xca2   : > { %v1095_v8 = vmul.f32 %v2456_v5, %v1093_v6 }
 0xca4   : > { %1097 = vrot.lane.b32.xlu1 %v1095_v8, %s2703_s30 }
 0xd16   : > { %v1098_v12 = vpop.permute.xlu1 %1097 }
 0xd17   : > { %v1100_v14 = vadd.f32 %v1098_v12, %v1090_v9 }
 0xd19   : > { %2457 = vtanh.f32 %v1100_v14 }
 0xd23   : > { %v2458_v15 = vpop.eup %2457 }
 0xd24   : > { %1103 = vrot.lane.b32.xlu0 %v2458_v15, %s2702_s25 }
 0xd96   : > { %v1104_v16 = vpop.permute.xlu0 %1103 }
 0xd97   : > { %v2989_v17 = vmul.f32 %v2456_v5, %v1104_v16 }
 0xd99   : > { %v1113_v18 = vpack.c.bf16 %v2989_v17, %v2989_v17 }
 0xd9b   : > { %1115 = vrot.lane.b32.xlu1 %v1113_v18, %s2703_s30 }
 0xe0d   : > { %v1116_v19 = vpop.permute.xlu1 %1115 }
 0xe0e   : > { %2271 = vmatmul.mubr.msk.bf16.vlgmr.msra.gmra.mrb[20].mxu0 %vm725_vm3, %v1116_v19 }
 0xe0f   : > { %2283 = vmatpush3.bf16.msra.mxu0 %v2871_v7  ;;  %2286 = vmatprep.mubr.msk.bf16.mxu0 %vm2700_vm0, %v2699_v1 }
 0xe10   : > { %2284 = vmatprep.subr.bf16.mxu0 %v2699_v1 }
 0xe13   : > { %2285 = vmatpush3.bf16.msra.mxu0 %v2881_v10 }
 0xe14   : > { %2298 = vmatprep.subr.bf16.mxu0 %v2699_v1 }
 0xee1   : > { %v1154_v21 = vpop.f32.mrb[20].mxu0 }
 0xee2   : > { %v1160_v22 = vadd.f32 %v1154_v21, %v1112_v20  ;;  %v2272_v23 = vpop.f32.mrb[21].mxu0 }
 0xee3   : > { %v1157_v24 = vpop.f32.mrb[22].mxu0  ;;  %v2413_v23 = vld [vmem:[%s3388_s6] sm:$0xff]  }
 0xee4   : > { %2459 = vtanh.f32 %v1160_v22  ;;  %v2273_v25 = vpop.f32.mrb[23].mxu0  ;;  %v2115_v7 = vmul.f32 -1.442695, %v1160_v22  ;;  %v2414_v24 = vld [vmem:[%s3388_s6 + $0x8] sm:$0xff]  }
 0xee6   : > { %2461 = vpow2.f32 %v2115_v7 }
 0xeee   : > { %v2460_v26 = vpop.eup %2459 }
 0xeef   : > { %1170 = vrot.lane.b32.xlu0 %v2460_v26, %s2702_s25  ;;  %v3059_v26 = vld [vmem:[%s3353_s7 + $0x8] sm:$0xff]  }
 0xef0   : > { %v2462_v27 = vpop.eup %2461 }
 0xef1   : > { %v1164_v28 = vadd.f32 1.0, %v2462_v27 }
 0xef3   : > { %2463 = vrcp.f32 %v1164_v28 }
 0xefd   : > { %v2464_v29 = vpop.eup %2463 }
 0xefe   : > { %v1168_v31 = vmul.f32 %v2464_v29, %v1100_v14 }
 0xf61   : > { %v1171_v30 = vpop.permute.xlu0 %1170 }
 0xf62   : > { %v1173_v10 = vmul.f32 %v2464_v29, %v1171_v30 }
 0xf64   : > { %1175 = vrot.lane.b32.xlu1 %v1173_v10, %s2703_s30 }
 0xfd6   : > { %v1176_v32 = vpop.permute.xlu1 %1175 }
 0xfd7   : > { %v1178_v34 = vadd.f32 %v1176_v32, %v1168_v31 }
 0xfd9   : > { %2465 = vtanh.f32 %v1178_v34 }
 0xfe3   : > { %v2466_v35 = vpop.eup %2465 }
 0xfe4   : > { %1181 = vrot.lane.b32.xlu0 %v2466_v35, %s2702_s25  ;;  %v2120_v35 = vld [vmem:[%s3354_s8] ss:$0 sm:$0xff] }
0x1056   : > { %v1182_v36 = vpop.permute.xlu0 %1181 }
0x1057   : > { %v3004_v37 = vmul.f32 %v2464_v29, %v1182_v36 }
0x1059   : > { %v1191_v38 = vpack.c.bf16 %v3004_v37, %v3004_v37 }
0x105b   : > { %1193 = vrot.lane.b32.xlu1 %v1191_v38, %s2703_s30 }
0x10cd   : > { %v1194_v39 = vpop.permute.xlu1 %1193 }
0x10ce   : > { %2279 = vmatmul.mubr.msk.bf16.vlgmr.msra.gmra.mrb[8].mxu1 %vm725_vm3, %v1194_v39 }
0x10cf   : > { %2294 = vmatprep.mubr.msk.bf16.mxu1 %vm2700_vm0, %v2699_v1  ;;  %2291 = vmatpush3.bf16.msra.mxu1 %v2413_v23 }
0x10d0   : > { %2292 = vmatprep.subr.bf16.mxu1 %v2699_v1 }
0x10d3   : > { %2293 = vmatpush3.bf16.msra.mxu1 %v2414_v24 }
0x10d4   : > { %2306 = vmatprep.subr.bf16.mxu1 %v2699_v1 }
0x11a1   : > { %v1232_v41 = vpop.f32.mrb[8].mxu1 }
0x11a2   : > { %v1238_v42 = vadd.f32 %v1232_v41, %v1190_v40  ;;  %v2280_v43 = vpop.f32.mrb[9].mxu1 }
0x11a3   : > { %v1235_v44 = vpop.f32.mrb[10].mxu1 }
0x11a4   : > { %2467 = vtanh.f32 %v1238_v42  ;;  %v2281_v45 = vpop.f32.mrb[11].mxu1  ;;  %v2117_v47 = vmul.f32 -1.442695, %v1238_v42 }
0x11a6   : > { %2469 = vpow2.f32 %v2117_v47 }
0x11ae   : > { %v2468_v46 = vpop.eup %2467 }
0x11af   : > { %1248 = vrot.lane.b32.xlu0 %v2468_v46, %s2702_s25 }
0x11b0   : > { %v2470_v48 = vpop.eup %2469 }
0x11b1   : > { %v1242_v49 = vadd.f32 1.0, %v2470_v48 }
0x11b3   : > { %2471 = vrcp.f32 %v1242_v49 }
0x11bd   : > { %v2472_v50 = vpop.eup %2471 }
0x11be   : > { %v1246_v54 = vmul.f32 %v2472_v50, %v1178_v34 }
0x1221   : > { %v1249_v52 = vpop.permute.xlu0 %1248 }
0x1222   : > { %v1251_v53 = vmul.f32 %v2472_v50, %v1249_v52 }
0x1224   : > { %1253 = vrot.lane.b32.xlu1 %v1251_v53, %s2703_s30 }
0x1296   : > { %v1254_v56 = vpop.permute.xlu1 %1253 }
0x1297   : > { %v1256_v57 = vadd.f32 %v1254_v56, %v1246_v54 }
0x1299   : > { %2473 = vtanh.f32 %v1256_v57 }
0x12a3   : > { %v2474_v58 = vpop.eup %2473 }
0x12a4   : > { %1259 = vrot.lane.b32.xlu0 %v2474_v58, %s2702_s25 }
0x1316   : > { %v1260_v59 = vpop.permute.xlu0 %1259 }
0x1317   : > { %v1262_v60 = vmul.f32 %v2472_v50, %v1260_v59 }
0x1319   : > { %v1269_v61 = vpack.c.bf16 %v1262_v60, %v1262_v60 }
0x131b   : > { %1271 = vrot.lane.b32.xlu1 %v1269_v61, %s2703_s30 }
0x138d   : > { %v1272_v62 = vpop.permute.xlu1 %1271 }
0x138e   : > { %2287 = vmatmul.mubr.msk.bf16.vlgmr.msra.gmra.mrb[24].mxu0 %vm725_vm3, %v1272_v62 }
0x138f   : > { %2302 = vmatprep.mubr.msk.bf16.mxu0 %vm2700_vm0, %v2699_v1 }
0x1461   : > { %v1310_v0 = vpop.f32.mrb[24].mxu0 }
0x1462   : > { %v1316_v2 = vadd.f32 %v1310_v0, %v1268_v63  ;;  %v2288_v3 = vpop.f32.mrb[25].mxu0 }
0x1463   : > { %v1313_v4 = vpop.f32.mrb[26].mxu0 }
0x1464   : > { %2475 = vtanh.f32 %v1316_v2  ;;  %v2289_v5 = vpop.f32.mrb[27].mxu0  ;;  %v2119_v8 = vmul.f32 -1.442695, %v1316_v2 }
0x1466   : > { %2477 = vpow2.f32 %v2119_v8 }
0x146e   : > { %v2476_v6 = vpop.eup %2475 }
0x146f   : > { %1326 = vrot.lane.b32.xlu0 %v2476_v6, %s2702_s25 }
0x1470   : > { %v2478_v9 = vpop.eup %2477 }
0x1471   : > { %v1320_v12 = vadd.f32 1.0, %v2478_v9 }
0x1473   : > { %2479 = vrcp.f32 %v1320_v12 }
0x147d   : > { %v2480_v14 = vpop.eup %2479 }
0x147e   : > { %v1324_v18 = vmul.f32 %v2480_v14, %v1256_v57 }
0x14e1   : > { %v1327_v15 = vpop.permute.xlu0 %1326 }
0x14e2   : > { %v1329_v16 = vmul.f32 %v2480_v14, %v1327_v15 }
0x14e4   : > { %1331 = vrot.lane.b32.xlu1 %v1329_v16, %s2703_s30 }
0x14e8   : > { %795 = vrot.lane.b32.xlu1 %v2929_v51, %s2703_s30 }
0x14ec   : > { %952 = vrot.lane.b32.xlu1 %v2959_v33, %s2703_s30 }
0x14f0   : > { %1108 = vrot.lane.b32.xlu1 %v2989_v17, %s2703_s30 }
0x14f4   : > { %1264 = vrot.lane.b32.xlu1 %v1262_v60, %s2703_s30 }
0x1556   : > { %v1332_v19 = vpop.permute.xlu1 %1331 }
0x1557   : > { %v3028_v20 = vadd.f32 %v1332_v19, %v1324_v18 }
0x1559   : > { %2481 = vtanh.f32 %v3028_v20 }
0x155a   : > { %v796_v21 = vpop.permute.xlu1 %795 }
0x155b   : > { %799 = vst.msk [vmem:[#allocation3] sm:$0x1] %vm798_vm4, %v796_v21 }
0x155e   : > { %v953_v22 = vpop.permute.xlu1 %952 }
0x155f   : > { %955 = vst.msk [vmem:[#allocation3 + $0x2] sm:$0x1] %vm798_vm4, %v953_v22 }
0x1562   : > { %v1109_v51 = vpop.permute.xlu1 %1108 }
0x1563   : > { %v2482_v33 = vpop.eup %2481  ;;  %1111 = vst.msk [vmem:[#allocation3 + $0x4] sm:$0x1] %vm798_vm4, %v1109_v51 }
0x1564   : > { %1337 = vrot.lane.b32.xlu0 %v2482_v33, %s2702_s25 }
0x1566   : > { %v1265_v17 = vpop.permute.xlu1 %1264 }
0x1567   : > { %1267 = vst.msk [vmem:[#allocation3 + $0x6] sm:$0x1] %vm798_vm4, %v1265_v17 }
0x1568   : > { %874 = vrot.lane.b32.xlu0 %v2944_v11, %s2703_s30 }
0x156c   : > { %1030 = vrot.lane.b32.xlu0 %v2974_v55, %s2703_s30  ;;  %v3053_v55 = vld [vmem:[%s3353_s7] sm:$0xff]  }
0x156d   : > { %2299 = vmatpush3.bf16.msra.mxu0 %v3053_v55 }
0x156e   : > { %2300 = vmatprep.subr.bf16.mxu0 %v2699_v1 }
0x1570   : > { %1186 = vrot.lane.b32.xlu0 %v3004_v37, %s2703_s30 }
0x1571   : > { %2301 = vmatpush3.bf16.msra.mxu0 %v3059_v26 }
0x1572   : > { %2314 = vmatprep.subr.bf16.mxu0 %v2699_v1 }
0x1574   : > { %2303 = vmatmul.mubr.bf16.vlgmr.msra.gmra.mrb[28].mxu0 %v2701_v13 }
0x1575   : > { %2315 = vmatpush3.bf16.msra.mxu0 %v3053_v55  ;;  %2318 = vmatprep.mubr.msk.bf16.mxu0 %vm2700_vm0, %v2699_v1 }
0x1576   : > { %2316 = vmatprep.subr.bf16.mxu0 %v2699_v1 }
0x1579   : > { %2317 = vmatpush3.bf16.msra.mxu0 %v3059_v26 }
0x157a   : > { %2330 = vmatprep.subr.bf16.mxu0 %v2699_v1 }
0x15d6   : > { %v1338_v11 = vpop.permute.xlu0 %1337 }
0x15d7   : > { %v1340_v25 = vmul.f32 %v2480_v14, %v1338_v11 }
0x15d9   : > { %1342 = vrot.lane.b32.xlu0 %v1340_v25, %s2703_s30 }
0x15da   : > { %v875_v7 = vpop.permute.xlu0 %874 }
0x15db   : > { %877 = vst.msk [vmem:[#allocation3 + $0x1] sm:$0x1] %vm798_vm4, %v875_v7 }
0x15de   : > { %v1031_v27 = vpop.permute.xlu0 %1030 }
0x15df   : > { %1033 = vst.msk [vmem:[#allocation3 + $0x3] sm:$0x1] %vm798_vm4, %v1031_v27 }
0x15e2   : > { %v1187_v28 = vpop.permute.xlu0 %1186 }
0x15e3   : > { %1189 = vst.msk [vmem:[#allocation3 + $0x5] sm:$0x1] %vm798_vm4, %v1187_v28 }
0x1647   : > { %v1472_v10 = vpop.f32.mrb[28].mxu0 }
0x1648   : > { %v2304_v31 = vpop.f32.mrb[29].mxu0 }
0x1649   : > { %v1475_v32 = vpop.f32.mrb[30].mxu0 }
0x164a   : > { %v2305_v34 = vpop.f32.mrb[31].mxu0 }
0x164b   : > { %v1343_v29 = vpop.permute.xlu0 %1342 }
0x164c   : > { %1345 = vst.msk [vmem:[#allocation3 + $0x7] sm:$0x1] %vm798_vm4, %v1343_v29  ;;  %1347 = vst.msk [vmem:[%s3367_s23] sm:$0x1] %vm798_vm4, %v1343_v29 }
0x1653   : > { %v3083_v13 = vld [vmem:[#allocation3] sm:$0xff] }
0x1654   : > { %v1353_v30 = vpack.c.bf16 %v3083_v13, %v3083_v13 }
0x1656   : > { %2295 = vmatmul.mubr.msk.bf16.vlgmr.msra.gmra.mrb[12].mxu1 %vm725_vm3, %v1353_v30 }
0x1657   : > { %2307 = vmatpush3.bf16.msra.mxu1 %v3053_v55  ;;  %2310 = vmatprep.mubr.msk.bf16.mxu1 %vm2700_vm0, %v2699_v1 }
0x1658   : > { %2308 = vmatprep.subr.bf16.mxu1 %v2699_v1 }
0x165b   : > { %2309 = vmatpush3.bf16.msra.mxu1 %v3059_v26 }
0x165c   : > { %2322 = vmatprep.subr.bf16.mxu1 %v2699_v1 }
0x1729   : > { %v1414_v36 = vpop.f32.mrb[12].mxu1 }
0x172a   : > { %v1415_v37 = vadd.f32 %v2120_v35, %v1414_v36  ;;  %v2296_v38 = vpop.f32.mrb[13].mxu1 }
0x172b   : > { %v1417_v39 = vpop.f32.mrb[14].mxu1 }
0x172c   : > { %1420 = vst [vmem:[#allocation2] sm:$0xff] %v1415_v37  ;;  %v2297_v40 = vpop.f32.mrb[15].mxu1 }
0x1733   : > { %v1425_v41 = vld [vmem:[#allocation2] sm:$0x3]  ;;  %v1509_v60 = vld [vmem:[#allocation2 + $0x2] sm:$0x3]  ;;  %v1587_v33 = vld [vmem:[#allocation2 + $0x4] sm:$0x3] }
0x1734   : > { %v1478_v42 = vadd.f32 %v1472_v10, %v1425_v41  ;;  %v1665_v39 = vld [vmem:[#allocation2 + $0x6] sm:$0x3] }
0x1736   : > { %2483 = vtanh.f32 %v1478_v42  ;;  %v2126_v44 = vmul.f32 -1.442695, %v1478_v42 }
0x1738   : > { %2485 = vpow2.f32 %v2126_v44 }
0x1740   : > { %v2484_v43 = vpop.eup %2483 }
0x1741   : > { %1488 = vrot.lane.b32.xlu1 %v2484_v43, %s2702_s25 }
0x1742   : > { %v2486_v45 = vpop.eup %2485 }
0x1743   : > { %v1482_v46 = vadd.f32 1.0, %v2486_v45 }
0x1745   : > { %2487 = vrcp.f32 %v1482_v46 }
0x174f   : > { %v2488_v47 = vpop.eup %2487 }
0x1750   : > { %v1486_v50 = vmul.f32 0.0, %v2488_v47 }
0x17b3   : > { %v1489_v48 = vpop.permute.xlu1 %1488 }
0x17b4   : > { %v1491_v49 = vmul.f32 %v2488_v47, %v1489_v48 }
0x17b6   : > { %1493 = vrot.lane.b32.xlu0 %v1491_v49, %s2703_s30 }
0x1828   : > { %v1494_v52 = vpop.permute.xlu0 %1493 }
0x1829   : > { %v1496_v53 = vadd.f32 %v1494_v52, %v1486_v50 }
0x182b   : > { %2489 = vtanh.f32 %v1496_v53 }
0x1835   : > { %v2490_v54 = vpop.eup %2489 }
0x1836   : > { %1499 = vrot.lane.b32.xlu1 %v2490_v54, %s2702_s25 }
0x18a8   : > { %v1500_v56 = vpop.permute.xlu1 %1499 }
0x18a9   : > { %v3100_v57 = vmul.f32 %v2488_v47, %v1500_v56 }
0x18ab   : > { %v1510_v58 = vpack.c.bf16 %v3100_v57, %v3100_v57 }
0x18ad   : > { %1512 = vrot.lane.b32.xlu0 %v1510_v58, %s2703_s30 }
0x191f   : > { %v1513_v59 = vpop.permute.xlu0 %1512 }
0x1920   : > { %2311 = vmatmul.mubr.msk.bf16.vlgmr.msra.gmra.mrb[16].mxu1 %vm725_vm3, %v1513_v59 }
0x1921   : > { %2323 = vmatpush3.bf16.msra.mxu1 %v3053_v55  ;;  %2326 = vmatprep.mubr.msk.bf16.mxu1 %vm2700_vm0, %v2699_v1 }
0x1922   : > { %2324 = vmatprep.subr.bf16.mxu1 %v2699_v1 }
0x1925   : > { %2325 = vmatpush3.bf16.msra.mxu1 %v3059_v26 }
0x19f3   : > { %v1551_v61 = vpop.f32.mrb[16].mxu1 }
0x19f4   : > { %v1557_v62 = vadd.f32 %v1551_v61, %v1509_v60  ;;  %v2312_v63 = vpop.f32.mrb[17].mxu1 }
0x19f5   : > { %v1554_v0 = vpop.f32.mrb[18].mxu1 }
0x19f6   : > { %2491 = vtanh.f32 %v1557_v62  ;;  %v2313_v2 = vpop.f32.mrb[19].mxu1  ;;  %v2128_v4 = vmul.f32 -1.442695, %v1557_v62 }
0x19f8   : > { %2493 = vpow2.f32 %v2128_v4 }
0x1a00   : > { %v2492_v3 = vpop.eup %2491 }
0x1a01   : > { %1567 = vrot.lane.b32.xlu1 %v2492_v3, %s2702_s25 }
0x1a02   : > { %v2494_v5 = vpop.eup %2493 }
0x1a03   : > { %v1561_v6 = vadd.f32 1.0, %v2494_v5 }
0x1a05   : > { %2495 = vrcp.f32 %v1561_v6 }
0x1a0f   : > { %v2496_v8 = vpop.eup %2495 }
0x1a10   : > { %v1565_v14 = vmul.f32 %v2496_v8, %v1496_v53 }
0x1a73   : > { %v1568_v9 = vpop.permute.xlu1 %1567 }
0x1a74   : > { %v1570_v12 = vmul.f32 %v2496_v8, %v1568_v9 }
0x1a76   : > { %1572 = vrot.lane.b32.xlu0 %v1570_v12, %s2703_s30 }
0x1ae8   : > { %v1573_v15 = vpop.permute.xlu0 %1572 }
0x1ae9   : > { %v1575_v16 = vadd.f32 %v1573_v15, %v1565_v14 }
0x1aeb   : > { %2497 = vtanh.f32 %v1575_v16 }
0x1af5   : > { %v2498_v18 = vpop.eup %2497 }
0x1af6   : > { %1578 = vrot.lane.b32.xlu1 %v2498_v18, %s2702_s25 }
0x1b68   : > { %v1579_v19 = vpop.permute.xlu1 %1578 }
0x1b69   : > { %v3114_v21 = vmul.f32 %v2496_v8, %v1579_v19 }
0x1b6b   : > { %v1588_v22 = vpack.c.bf16 %v3114_v21, %v3114_v21 }
0x1b6d   : > { %1590 = vrot.lane.b32.xlu0 %v1588_v22, %s2703_s30 }
0x1bdf   : > { %v1591_v51 = vpop.permute.xlu0 %1590 }
0x1be0   : > { %2319 = vmatmul.mubr.msk.bf16.vlgmr.msra.gmra.mrb[32].mxu0 %vm725_vm3, %v1591_v51 }
0x1be1   : > { %2334 = vmatprep.mubr.msk.bf16.mxu0 %vm2700_vm0, %v2699_v1 }
0x1cb3   : > { %v1629_v17 = vpop.f32.mrb[32].mxu0 }
0x1cb4   : > { %v1635_v23 = vadd.f32 %v1629_v17, %v1587_v33  ;;  %v2320_v24 = vpop.f32.mrb[33].mxu0 }
0x1cb5   : > { %v1632_v11 = vpop.f32.mrb[34].mxu0 }
0x1cb6   : > { %2499 = vtanh.f32 %v1635_v23  ;;  %v2321_v55 = vpop.f32.mrb[35].mxu0  ;;  %v2130_v26 = vmul.f32 -1.442695, %v1635_v23 }
0x1cb8   : > { %2501 = vpow2.f32 %v2130_v26 }
0x1cc0   : > { %v2500_v25 = vpop.eup %2499 }
0x1cc1   : > { %1645 = vrot.lane.b32.xlu1 %v2500_v25, %s2702_s25 }
0x1cc2   : > { %v2502_v7 = vpop.eup %2501 }
0x1cc3   : > { %v1639_v27 = vadd.f32 1.0, %v2502_v7 }
0x1cc5   : > { %2503 = vrcp.f32 %v1639_v27 }
0x1ccf   : > { %v2504_v28 = vpop.eup %2503 }
0x1cd0   : > { %v1643_v10 = vmul.f32 %v2504_v28, %v1575_v16 }
0x1d33   : > { %v1646_v29 = vpop.permute.xlu1 %1645 }
0x1d34   : > { %v1648_v30 = vmul.f32 %v2504_v28, %v1646_v29 }
0x1d36   : > { %1650 = vrot.lane.b32.xlu0 %v1648_v30, %s2703_s30 }
0x1da8   : > { %v1651_v31 = vpop.permute.xlu0 %1650 }
0x1da9   : > { %v1653_v32 = vadd.f32 %v1651_v31, %v1643_v10 }
0x1dab   : > { %2505 = vtanh.f32 %v1653_v32 }
0x1db5   : > { %v2506_v34 = vpop.eup %2505 }
0x1db6   : > { %1656 = vrot.lane.b32.xlu1 %v2506_v34, %s2702_s25 }
0x1e28   : > { %v1657_v35 = vpop.permute.xlu1 %1656 }
0x1e29   : > { %v1659_v36 = vmul.f32 %v2504_v28, %v1657_v35 }
0x1e2b   : > { %v1666_v37 = vpack.c.bf16 %v1659_v36, %v1659_v36 }
0x1e2d   : > { %1668 = vrot.lane.b32.xlu0 %v1666_v37, %s2703_s30 }
0x1e9f   : > { %v1669_v38 = vpop.permute.xlu0 %1668 }
0x1ea0   : > { %2327 = vmatmul.mubr.msk.bf16.vlgmr.msra.gmra.mrb[20].mxu1 %vm725_vm3, %v1669_v38 }
0x1f73   : > { %v1707_v40 = vpop.f32.mrb[20].mxu1 }
0x1f74   : > { %v1713_v41 = vadd.f32 %v1707_v40, %v1665_v39  ;;  %v2328_v42 = vpop.f32.mrb[21].mxu1 }
0x1f75   : > { %v1710_v43 = vpop.f32.mrb[22].mxu1 }
0x1f76   : > { %2507 = vtanh.f32 %v1713_v41  ;;  %v2329_v44 = vpop.f32.mrb[23].mxu1  ;;  %v2132_v46 = vmul.f32 -1.442695, %v1713_v41 }
0x1f78   : > { %2509 = vpow2.f32 %v2132_v46 }
0x1f80   : > { %v2508_v45 = vpop.eup %2507 }
0x1f81   : > { %1723 = vrot.lane.b32.xlu1 %v2508_v45, %s2702_s25 }
0x1f82   : > { %v2510_v47 = vpop.eup %2509 }
0x1f83   : > { %v1717_v48 = vadd.f32 1.0, %v2510_v47 }
0x1f85   : > { %2511 = vrcp.f32 %v1717_v48 }
0x1f8f   : > { %v2512_v49 = vpop.eup %2511 }
0x1f90   : > { %v1721_v53 = vmul.f32 %v2512_v49, %v1653_v32 }
0x1ff3   : > { %v1724_v50 = vpop.permute.xlu1 %1723 }
0x1ff4   : > { %v1726_v52 = vmul.f32 %v2512_v49, %v1724_v50 }
0x1ff6   : > { %1728 = vrot.lane.b32.xlu0 %v1726_v52, %s2703_s30 }
0x1ffa   : > { %1504 = vrot.lane.b32.xlu0 %v3100_v57, %s2703_s30  ;;  %v2418_v57 = vld [vmem:[%s3355_s9 + $0x8] sm:$0xff]  }
0x1ffe   : > { %1661 = vrot.lane.b32.xlu0 %v1659_v36, %s2703_s30 }
0x2002   : > { %1349 = vrot.lane.b32.xlu0 %v3028_v20, %s2704_s24  ;;  %v2417_v20 = vld [vmem:[%s3355_s9] sm:$0xff]  }
0x2003   : > { %2331 = vmatpush3.bf16.msra.mxu0 %v2417_v20 }
0x2004   : > { %2332 = vmatprep.subr.bf16.mxu0 %v2699_v1 }
0x2007   : > { %2333 = vmatpush3.bf16.msra.mxu0 %v2418_v57 }
0x2068   : > { %v1729_v54 = vpop.permute.xlu0 %1728 }
0x2069   : > { %v1731_v56 = vadd.f32 %v1729_v54, %v1721_v53 }
0x206b   : > { %2513 = vtanh.f32 %v1731_v56 }
0x206c   : > { %v1505_v58 = vpop.permute.xlu0 %1504 }
0x206d   : > { %1508 = vst.msk [vmem:[#allocation3] sm:$0x3] %vm1507_vm5, %v1505_v58 }
0x2070   : > { %v1662_v59 = vpop.permute.xlu0 %1661 }
0x2071   : > { %1664 = vst.msk [vmem:[#allocation3 + $0x4] sm:$0x3] %vm1507_vm5, %v1662_v59 }
0x2074   : > { %v1350_v60 = vpop.permute.xlu0 %1349 }
0x2075   : > { %v2514_v61 = vpop.eup %2513  ;;  %1352 = vst.msk [vmem:[%s515_s27] sm:$0x1] %vm798_vm4, %v1350_v60 }
0x2076   : > { %1734 = vrot.lane.b32.xlu1 %v2514_v61, %s2702_s25  ;;  %s2090_s25 = sshll.u32 %s3076_s16, 1 }
0x2077   : > { %s3151_s29 = scalar_lea.vmem [#allocation9], %s2090_s25 }
0x207a   : > { %1583 = vrot.lane.b32.xlu1 %v3114_v21, %s2703_s30 }
0x20e8   : > { %v1735_v62 = vpop.permute.xlu1 %1734 }
0x20e9   : > { %v1737_v63 = vmul.f32 %v2512_v49, %v1735_v62 }
0x20eb   : > { %1739 = vrot.lane.b32.xlu1 %v1737_v63, %s2703_s30  ;;  %s3155_s30 = scalar_lea.vmem [#allocation11], %s2090_s25  ;;  %s3170_s25 = scalar_lea.hbm %s3358_s12, %s3368_s20 }
0x20ec   : > { %v1584_v0 = vpop.permute.xlu1 %1583 }
0x20ed   : > { %1586 = vst.msk [vmem:[#allocation3 + $0x2] sm:$0x3] %vm1507_vm5, %v1584_v0 }
0x20ef   : > { %1747 = vrot.lane.b32.xlu1 %v1731_v56, %s2704_s24  ;;  %s3161_s24 = sshll.u32 %s515_s27, 4  ;;  %s2705_s27 = smov [#allocation6]   ;;  %s3229_s24 = int_to_ptr.vmem [resolvable:$true] %s3161_s24 }
0x20f0   : > { %s2519_s5 = sshll.u32 %s2705_s27, 4  ;;  %s2520_s5 = int_to_ptr.vmem [resolvable:$false] %s2519_s5 }
0x20f1   : > { %s2521_s6 = scalar_lea.vmem %s2520_s5, 32  ;;  %p2522_p0 = scmp.lt.s32.totalorder %s1865_s2, %s2520_s5 }
0x20f2   : > { %p2523_p1 = scmp.lt.s32.totalorder %s2521_s6, %s2515_s4 }
0x20f4   : > { %p2524_p2 = por %p2523_p1, %p2522_p0 }
0x20f6   : > { %p2525_p3 = pnand %p2524_p2, %p2518_p13 }
0x215d   : > { %v1740_v2 = vpop.permute.xlu1 %1739 }
0x215e   : > { %1742 = vst.msk [vmem:[#allocation3 + $0x6] sm:$0x3] %vm1507_vm5, %v1740_v2  ;;  %1745 = vst.msk [vmem:[%s3151_s29] sm:$0x3] %vm1507_vm5, %v1740_v2 }
0x2161   : > { %v1748_v1 = vpop.permute.xlu1 %1747 }
0x2162   : > { %1750 = vst.msk [vmem:[%s3155_s30] sm:$0x3] %vm1507_vm5, %v1748_v1 }
0x2165   : > { %v1743_v3 = vld [vmem:[#allocation3] sm:$0xff] }
0x2166   : > { %v1744_v4 = vadd.f32 %v1743_v3, %v3083_v13 }
0x2168   : > { %v1751_v5 = vpack.c.bf16 %v1744_v4, %v1744_v4 }
0x216a   : > { %2335 = vmatmul.mubr.msk.bf16.vlgmr.msra.gmra.mrb[36].mxu0 %vm725_vm3, %v1751_v5 }
0x216b   : > { %2528 = shalt.err (!%p2525_p3)
}
0x216c   : > { %s2529_s1 = scalar_lea.hbm %s3170_s25, 16  ;;  %s2533_s27 = scalar_lea.hbm %s3358_s12, 32 }
0x216d   : > { %p2530_p4 = scmp.ne.s32.totalorder %s3170_s25, %s2529_s1  ;;  %p2534_p9 = scmp.lt.u32.totalorder %s3170_s25, %s3358_s12 }
0x216e   : > { %p2535_p10 = scmp.lt.u32.totalorder %s2533_s27, %s2529_s1  ;;  %p2537_p12 = scmp.lt.u32.totalorder %s2529_s1, %s3170_s25 }
0x216f   : > { %p2531_p7 = pnand %p2530_p4, %p2830_p5 }
0x2170   : > { %p2536_p11 = por %p2535_p10, %p2534_p9 }
0x2171   : > { %p2532_p8 = pneg %p2531_p7 }
0x2172   : > { %p2538_p13 = por %p2537_p12, %p2536_p11 }
0x2174   : > { %p2539_p0 = pnand %p2538_p13, %p2532_p8 }
0x2176   : > { %2542 = shalt.err (!%p2539_p0)
}
0x2177   : > { %2339 = dma.vmem_to_hbm [thread:$0]  (%p2830_p5), %s1865_s2, 16, %s3170_s25, %s3177_s3  }
0x2178   : > { %s2143_s4 = sshll.u32 %s2811_s22, 5  ;;  %s1890_s6 = sshll.u32 %s3151_s29, 4  ;;  %s1891_s6 = int_to_ptr.vmem [resolvable:$true] %s1890_s6 }
0x2179   : > { %s3204_s1 = scalar_lea.hbm %s3360_s14, %s2143_s4  ;;  %s3208_s26 = scalar_lea.sflag [#allocation10], %s1824_s17 }
0x217a   : > { %s2543_s27 = scalar_lea.vmem %s1891_s6, 32  ;;  %s2706_s5 = smov [#allocation9]  }
0x217b   : > { %p2544_p1 = scmp.ne.s32.totalorder %s1891_s6, %s2543_s27  ;;  %s2547_s20 = sshll.u32 %s2706_s5, 4  ;;  %s2548_s20 = int_to_ptr.vmem [resolvable:$false] %s2547_s20 }
0x217c   : > { %s2549_s2 = scalar_lea.vmem %s2548_s20, 64  ;;  %p2550_p4 = scmp.lt.s32.totalorder %s1891_s6, %s2548_s20 }
0x217d   : > { %p2545_p2 = pnand %p2544_p1, %p2830_p5  ;;  %p2551_p7 = scmp.lt.s32.totalorder %s2549_s2, %s2543_s27 }
0x217f   : > { %p2546_p3 = pneg %p2545_p2  ;;  %p2552_p8 = por %p2551_p7, %p2550_p4 }
0x2181   : > { %p2553_p9 = pnand %p2552_p8, %p2546_p3 }
0x2183   : > { %2556 = shalt.err (!%p2553_p9)
}
0x2184   : > { %s2557_s29 = scalar_lea.hbm %s3204_s1, 32  ;;  %s2561_s0 = scalar_lea.hbm %s3360_s14, 64 }
0x2185   : > { %p2558_p10 = scmp.ne.s32.totalorder %s3204_s1, %s2557_s29  ;;  %p2562_p13 = scmp.lt.u32.totalorder %s3204_s1, %s3360_s14 }
0x2186   : > { %p2563_p0 = scmp.lt.u32.totalorder %s2561_s0, %s2557_s29  ;;  %p2565_p2 = scmp.lt.u32.totalorder %s2557_s29, %s3204_s1 }
0x2187   : > { %p2559_p11 = pnand %p2558_p10, %p2830_p5 }
0x2188   : > { %p2564_p1 = por %p2563_p0, %p2562_p13 }
0x2189   : > { %p2560_p12 = pneg %p2559_p11 }
0x218a   : > { %p2566_p3 = por %p2565_p2, %p2564_p1 }
0x218c   : > { %p2567_p4 = pnand %p2566_p3, %p2560_p12 }
0x218e   : > { %2570 = shalt.err (!%p2567_p4)
}
0x218f   : > { %2341 = dma.vmem_to_hbm [thread:$0]  (%p2830_p5), %s1891_s6, 32, %s3204_s1, %s3208_s26  }
0x2190   : > { %s3390_s27 = sshll.u32 %s2811_s22, 4  ;;  %s3391_s17 = sshll.u32 %s3155_s30, 4  ;;  %s3240_s17 = int_to_ptr.vmem [resolvable:$true] %s3391_s17 }
0x2191   : > { %s3236_s29 = scalar_lea.hbm %s3359_s13, %s3390_s27  ;;  %s3247_s23 = scalar_lea.hbm %s3361_s15, %s2143_s4 }
0x2192   : > { %s2571_s6 = scalar_lea.vmem %s3229_s24, 16  ;;  %s2707_s1 = smov [#allocation8]  }
0x2193   : > { %p2572_p7 = scmp.ne.s32.totalorder %s3229_s24, %s2571_s6  ;;  %s2575_s20 = sshll.u32 %s2707_s1, 4  ;;  %s2576_s20 = int_to_ptr.vmem [resolvable:$false] %s2575_s20 }
0x2194   : > { %s2577_s5 = scalar_lea.vmem %s2576_s20, 32  ;;  %p2578_p10 = scmp.lt.s32.totalorder %s3229_s24, %s2576_s20 }
0x2195   : > { %p2573_p8 = pnand %p2572_p7, %p2830_p5  ;;  %p2579_p11 = scmp.lt.s32.totalorder %s2577_s5, %s2571_s6 }
0x2197   : > { %p2574_p9 = pneg %p2573_p8  ;;  %p2580_p12 = por %p2579_p11, %p2578_p10 }
0x2199   : > { %p2581_p13 = pnand %p2580_p12, %p2574_p9 }
0x219b   : > { %2584 = shalt.err (!%p2581_p13)
}
0x219c   : > { %s2585_s30 = scalar_lea.hbm %s3236_s29, 16  ;;  %s2589_s2 = scalar_lea.hbm %s3359_s13, 32 }
0x219d   : > { %p2586_p0 = scmp.ne.s32.totalorder %s3236_s29, %s2585_s30  ;;  %p2590_p3 = scmp.lt.u32.totalorder %s3236_s29, %s3359_s13 }
0x219e   : > { %p2591_p4 = scmp.lt.u32.totalorder %s2589_s2, %s2585_s30  ;;  %p2593_p8 = scmp.lt.u32.totalorder %s2585_s30, %s3236_s29 }
0x219f   : > { %p2587_p1 = pnand %p2586_p0, %p2830_p5 }
0x21a0   : > { %p2592_p7 = por %p2591_p4, %p2590_p3 }
0x21a1   : > { %p2588_p2 = pneg %p2587_p1 }
0x21a2   : > { %p2594_p9 = por %p2593_p8, %p2592_p7 }
0x21a4   : > { %p2595_p10 = pnand %p2594_p9, %p2588_p2 }
0x21a6   : > { %2598 = shalt.err (!%p2595_p10)
}
0x21a7   : > { %2340 = dma.vmem_to_hbm [thread:$0]  (%p2830_p5), %s3229_s24, 16, %s3236_s29, %s3177_s3  }
0x21a8   : > { %s2599_s6 = scalar_lea.vmem %s3240_s17, 32  ;;  %s2708_s1 = smov [#allocation11]  }
0x21a9   : > { %p2600_p11 = scmp.ne.s32.totalorder %s3240_s17, %s2599_s6  ;;  %s2603_s20 = sshll.u32 %s2708_s1, 4  ;;  %s2604_s20 = int_to_ptr.vmem [resolvable:$false] %s2603_s20 }
0x21aa   : > { %s2605_s5 = scalar_lea.vmem %s2604_s20, 64  ;;  %p2606_p0 = scmp.lt.s32.totalorder %s3240_s17, %s2604_s20 }
0x21ab   : > { %p2601_p12 = pnand %p2600_p11, %p2830_p5  ;;  %p2607_p1 = scmp.lt.s32.totalorder %s2605_s5, %s2599_s6 }
0x21ad   : > { %p2602_p13 = pneg %p2601_p12  ;;  %p2608_p2 = por %p2607_p1, %p2606_p0 }
0x21af   : > { %p2609_p3 = pnand %p2608_p2, %p2602_p13 }
0x21b1   : > { %2612 = shalt.err (!%p2609_p3)
}
0x21b2   : > { %s2613_s3 = scalar_lea.hbm %s3247_s23, 32  ;;  %s2617_s30 = scalar_lea.hbm %s3361_s15, 64 }
0x21b3   : > { %p2614_p4 = scmp.ne.s32.totalorder %s3247_s23, %s2613_s3  ;;  %p2618_p9 = scmp.lt.u32.totalorder %s3247_s23, %s3361_s15 }
0x21b4   : > { %p2619_p10 = scmp.lt.u32.totalorder %s2617_s30, %s2613_s3  ;;  %p2621_p12 = scmp.lt.u32.totalorder %s2613_s3, %s3247_s23 }
0x21b5   : > { %p2615_p7 = pnand %p2614_p4, %p2830_p5 }
0x21b6   : > { %p2620_p11 = por %p2619_p10, %p2618_p9 }
0x21b7   : > { %p2616_p8 = pneg %p2615_p7 }
0x21b8   : > { %p2622_p13 = por %p2621_p12, %p2620_p11 }
0x21ba   : > { %p2623_p0 = pnand %p2622_p13, %p2616_p8 }
0x21bc   : > { %2626 = shalt.err (!%p2623_p0)
}
0x21bd   : > { %2342 = dma.vmem_to_hbm [thread:$0]  (%p2830_p5), %s3240_s17, 32, %s3247_s23, %s3208_s26   ;;  %v2133_v13 = vld [vmem:[%s3356_s10] ss:$0 sm:$0xff] }
0x21be   : > { %s2089_s2 = sshll.u32 %s3076_s16, 3  ;;  %s2140_s6 = sshll.u32 %s2811_s22, 7 }
0x21bf   : > { %s503_s1 = scalar_lea.vmem [#allocation4], %s2089_s2  ;;  %s3301_s24 = scalar_lea.hbm %s3357_s11, %s2140_s6 }
0x21c0   : > { %s1851_s20 = sshll.u32 %s503_s1, 4  ;;  %s1820_s26 = scalar_lea.sflag [#allocation5], %s3076_s16  ;;  %s3303_s20 = int_to_ptr.vmem [resolvable:$true] %s1851_s20 }
0x21c1   : > { %s2627_s22 = scalar_lea.vmem %s3303_s20, 128  ;;  %s2709_s17 = smov [#allocation4]  }
0x21c2   : > { %p2628_p1 = scmp.ne.s32.totalorder %s3303_s20, %s2627_s22  ;;  %s2631_s23 = sshll.u32 %s2709_s17, 4  ;;  %s2632_s23 = int_to_ptr.vmem [resolvable:$false] %s2631_s23 }
0x21c3   : > { %s2633_s29 = scalar_lea.vmem %s2632_s23, 256  ;;  %p2634_p4 = scmp.lt.s32.totalorder %s3303_s20, %s2632_s23 }
0x21c4   : > { %p2629_p2 = pnand %p2628_p1, %p2830_p5  ;;  %p2635_p7 = scmp.lt.s32.totalorder %s2633_s29, %s2627_s22 }
0x21c6   : > { %p2630_p3 = pneg %p2629_p2  ;;  %p2636_p8 = por %p2635_p7, %p2634_p4 }
0x21c8   : > { %p2637_p9 = pnand %p2636_p8, %p2630_p3 }
0x223d   : > { %v1812_v6 = vpop.f32.mrb[36].mxu0 }
0x223e   : > { %v1813_v8 = vadd.f32 %v2133_v13, %v1812_v6  ;;  %v2336_v9 = vpop.f32.mrb[37].mxu0 }
0x223f   : > { %v1815_v12 = vpop.f32.mrb[38].mxu0 }
0x2240   : > { %1818 = vst [vmem:[%s503_s1] sm:$0xff] %v1813_v8  ;;  %v2337_v14 = vpop.f32.mrb[39].mxu0 }
0x2241   : > { %2640 = shalt.err (!%p2637_p9)
}
0x2242   : > { %s2641_s16 = scalar_lea.hbm %s3301_s24, 128  ;;  %s2645_s27 = scalar_lea.hbm %s3357_s11, 256 }
0x2243   : > { %p2642_p10 = scmp.ne.s32.totalorder %s3301_s24, %s2641_s16  ;;  %p2646_p13 = scmp.lt.u32.totalorder %s3301_s24, %s3357_s11 }
0x2244   : > { %p2647_p0 = scmp.lt.u32.totalorder %s2645_s27, %s2641_s16  ;;  %p2649_p2 = scmp.lt.u32.totalorder %s2641_s16, %s3301_s24 }
0x2245   : > { %p2643_p11 = pnand %p2642_p10, %p2830_p5 }
0x2246   : > { %p2648_p1 = por %p2647_p0, %p2646_p13 }
0x2247   : > { %p2644_p12 = pneg %p2643_p11 }
0x2248   : > { %p2650_p3 = por %p2649_p2, %p2648_p1 }
0x224a   : > { %p2651_p4 = pnand %p2650_p3, %p2644_p12 }
0x224c   : > { %2654 = shalt.err (!%p2651_p4)
}
0x224d   : > { %2338 = dma.vmem_to_hbm [thread:$0]  (%p2830_p5), %s3303_s20, 128, %s3301_s24, %s1820_s26  }
0x224e PF: > { %p2364_p7 = scmp.ge.s32.totalorder %s2697_s21, 2  ;;  %s1915_s6 = sand.u32 1, %s2685_s18  }
0x224f   : > { %s1916_s1 = scalar_lea.sflag [#allocation5], %s1915_s6 }
0x2250   : > { %p2349_p8 = pnand %p2364_p7, %p2834_p6 }
0x2252   : > { %2672 = dma.done.wait (!%p2349_p8), %s1916_s1, 128  }
0x2253   : > { %2674 = vsyncadd (!%p2349_p8), %s1916_s1, 4294967168  ;;  %s3393_s5 = sadd.s32 4294967294, %s2697_s21  }
0x2254   : > { %s1924_s3 = sand.u32 1, %s3393_s5  }
0x2255   : > { %s1925_s22 = scalar_lea.sflag [#allocation7], %s1924_s3 }
0x2256   : > { %2676 = dma.done.wait (!%p2349_p8), %s1925_s22, 32  }
0x2257   : > { %2678 = vsyncadd (!%p2349_p8), %s1925_s22, 4294967264  ;;  %s1941_s28 = scalar_lea.sflag [#allocation10], %s1924_s3 }
0x2258   : > { %2680 = dma.done.wait (!%p2349_p8), %s1941_s28, 64  }
0x2259   : > { %2682 = vsyncadd (!%p2349_p8), %s1941_s28, 4294967232  ;;  %s3394_s21 = sld [smem:[#allocation16_spill]]  ;;  %s3395_s20 = sld [smem:[#allocation15_spill]] }
0x225a   : > { %s3396_s24 = sld [smem:[#allocation17_spill]]  ;;  %s3397_s18 = smov %s2689_s19 }
0x225f   : > { %p32_p5 = scmp.ge.s32.totalorder %s3394_s21, 4   ;;  %s3398_s19 = smov %s3395_s20 }
0x2260   : > { %s3399_s20 = smov %s3396_s24 }
0x2261   :  { %34 = sbr.rel (!%p32_p5) target bundleno = 15 (0xf), region = 166 }
0x2268   :  { %1955 = vsyncpa [#allocation5], 1 }
0x2269   :  { %1957 = vsyncpa [#allocation5 + $0x1], 1 }
0x226a   :  { %1958 = vsyncpa [#allocation7], 1 }
0x226b   :  { %1960 = vsyncpa [#allocation7 + $0x1], 1 }
0x226c   :  { %1961 = vsyncpa [#allocation10], 1 }
0x226d   :  { %1963 = vsyncpa [#allocation10 + $0x1], 1 }

</bundles_post_ra>
